<compile_context>
chip_gen: v5e
topology: v5e:2x2
jax: 0.10.0
libtpu: 0.0.40
codegen_flags: <defaults>
</compile_context>

<pallas_src>
import functools
import math

import jax
import jax.numpy as jnp
from jax.experimental import pallas as pl
from jax.experimental.pallas import tpu as pltpu


# ----------------------------------------------------------------------------
# In-kernel helpers (operate on VMEM-resident values)
# ----------------------------------------------------------------------------

def _softmax(s):
    s = s - jnp.max(s, axis=-1, keepdims=True)
    e = jnp.exp(s)
    # TODO(synk): approx=True routes this to the EUP slot at production sizes.
    return e * pl.reciprocal(jnp.sum(e, axis=-1, keepdims=True))


def _layernorm(z, g, b, eps):
    mu = jnp.mean(z, axis=-1, keepdims=True)
    var = jnp.mean((z - mu) ** 2, axis=-1, keepdims=True)
    return (z - mu) * jax.lax.rsqrt(var + eps) * g + b


def _mha(xq, xkv, w_qkv, b_qkv, w_o, b_o, mask, heads):
    """Multi-head attention on VMEM values with head-major packed weights.

    xq: (Tq, H)  xkv: (Tk, H)
    w_qkv: (3*heads, H, d)  [q heads | k heads | v heads]
    b_qkv: (3*heads, 1, d)
    w_o:   (heads, d, H)    b_o: (1, H)
    mask:  (Tq, Tk) bool, True = attend
    """
    tq, H = xq.shape
    d = w_qkv.shape[-1]
    scale = 1.0 / math.sqrt(d)
    out = jnp.zeros((tq, H), jnp.float32)
    for h in range(heads):
        q = jnp.dot(xq, w_qkv[h], preferred_element_type=jnp.float32) + b_qkv[h]
        k = (jnp.dot(xkv, w_qkv[heads + h], preferred_element_type=jnp.float32)
             + b_qkv[heads + h])
        v = (jnp.dot(xkv, w_qkv[2 * heads + h], preferred_element_type=jnp.float32)
             + b_qkv[2 * heads + h])
        # q @ k^T without materializing a transpose (contract last dims).
        s = jax.lax.dot_general(q, k, (((1,), (1,)), ((), ())),
                                preferred_element_type=jnp.float32) * scale
        s = jnp.where(mask, s, -1e6)                 # d2l masked_softmax semantics
        p = _softmax(s)
        o = jnp.dot(p, v, preferred_element_type=jnp.float32)
        # concat-over-heads followed by W_o  ==  sum_h o_h @ W_o[h*d:(h+1)*d, :]
        out = out + jnp.dot(o, w_o[h], preferred_element_type=jnp.float32)
    return out + b_o


# ----------------------------------------------------------------------------
# Fused encoder-stack kernel: grid = (batch, layer)
# ----------------------------------------------------------------------------

def _encoder_kernel(valid_ref, src_ref, pe_ref, wemb_ref, bemb_ref,
                    wattn_ref, battn_ref, wo_ref, bo_ref,
                    w1_ref, b1_ref, w2_ref, b2_ref,
                    ln1g_ref, ln1b_ref, ln2g_ref, ln2b_ref,
                    out_ref, x_scr, *, heads, scale_emb, eps):
    b = pl.program_id(0)
    l = pl.program_id(1)
    S, H = x_scr.shape

    # layer 0: Linear embedding * sqrt(H) + positional encoding (dropout == id)
    @pl.when(l == 0)
    def _():
        emb = (jnp.dot(src_ref[0], wemb_ref[...],
                       preferred_element_type=jnp.float32) + bemb_ref[...])
        x_scr[...] = emb * scale_emb + pe_ref[...]

    x = x_scr[...]
    # key-padding mask from src valid lens (SMEM scalar prefetch)
    mask = jax.lax.broadcasted_iota(jnp.int32, (S, S), 1) < valid_ref[b]

    y = _mha(x, x, wattn_ref[0], battn_ref[0], wo_ref[0], bo_ref[0], mask, heads)
    z1 = _layernorm(x + y, ln1g_ref[0], ln1b_ref[0], eps)

    hidden = jnp.maximum(
        jnp.dot(z1, w1_ref[0], preferred_element_type=jnp.float32) + b1_ref[0], 0.0)
    y2 = jnp.dot(hidden, w2_ref[0], preferred_element_type=jnp.float32) + b2_ref[0]
    z2 = _layernorm(z1 + y2, ln2g_ref[0], ln2b_ref[0], eps)

    x_scr[...] = z2

    @pl.when(l == pl.num_programs(1) - 1)
    def _():
        out_ref[0, :, :] = z2


# ----------------------------------------------------------------------------
# Fused decoder-stack kernel: grid = (batch, layer)
# ----------------------------------------------------------------------------

def _decoder_kernel(valid_ref, tgt_ref, pe_ref, enc_ref, wemb_ref, bemb_ref,
                    wout_ref, bout_ref,
                    wattn1_ref, battn1_ref, wo1_ref, bo1_ref,
                    wattn2_ref, battn2_ref, wo2_ref, bo2_ref,
                    w1_ref, b1_ref, w2_ref, b2_ref,
                    ln1g_ref, ln1b_ref, ln2g_ref, ln2b_ref, ln3g_ref, ln3b_ref,
                    out_ref, x_scr, *, heads, scale_emb, eps):
    b = pl.program_id(0)
    l = pl.program_id(1)
    S, H = x_scr.shape
    Te = enc_ref.shape[1]

    @pl.when(l == 0)
    def _():
        emb = (jnp.dot(tgt_ref[0], wemb_ref[...],
                       preferred_element_type=jnp.float32) + bemb_ref[...])
        x_scr[...] = emb * scale_emb + pe_ref[...]

    x = x_scr[...]
    enc = enc_ref[0]

    # masked (causal) self-attention; mask generated in-kernel
    causal = (jax.lax.broadcasted_iota(jnp.int32, (S, S), 1)
              <= jax.lax.broadcasted_iota(jnp.int32, (S, S), 0))
    y1 = _mha(x, x, wattn1_ref[0], battn1_ref[0], wo1_ref[0], bo1_ref[0],
              causal, heads)
    z1 = _layernorm(x + y1, ln1g_ref[0], ln1b_ref[0], eps)

    # encoder-decoder cross attention; key mask from enc_valid_lens (SMEM)
    cross = jax.lax.broadcasted_iota(jnp.int32, (S, Te), 1) < valid_ref[b]
    y2 = _mha(z1, enc, wattn2_ref[0], battn2_ref[0], wo2_ref[0], bo2_ref[0],
              cross, heads)
    z2 = _layernorm(z1 + y2, ln2g_ref[0], ln2b_ref[0], eps)

    # position-wise FFN
    hidden = jnp.maximum(
        jnp.dot(z2, w1_ref[0], preferred_element_type=jnp.float32) + b1_ref[0], 0.0)
    y3 = jnp.dot(hidden, w2_ref[0], preferred_element_type=jnp.float32) + b2_ref[0]
    xn = _layernorm(z2 + y3, ln3g_ref[0], ln3b_ref[0], eps)
    x_scr[...] = xn

    # final layer: output head (dense + softmax) written straight to the HBM block
    @pl.when(l == pl.num_programs(1) - 1)
    def _():
        logits = (jnp.dot(xn, wout_ref[...], preferred_element_type=jnp.float32)
                  + bout_ref[...])
        out_ref[0, :, :] = _softmax(logits)


# ----------------------------------------------------------------------------
# BlockSpec helpers
# ----------------------------------------------------------------------------

def _spec_const(arr):
    n = arr.ndim
    return pl.BlockSpec(arr.shape, lambda b, l, *_: (0,) * n)


def _spec_batch(arr):
    n = arr.ndim
    return pl.BlockSpec((1,) + arr.shape[1:], lambda b, l, *_: (b,) + (0,) * (n - 1))


def _spec_layer(arr):
    n = arr.ndim
    return pl.BlockSpec((1,) + arr.shape[1:], lambda b, l, *_: (l,) + (0,) * (n - 1))


# ----------------------------------------------------------------------------
# Host-side weight packing (head-major, stacked over layers)
# ----------------------------------------------------------------------------

def positional_encoding(seq_len, H):
    pos = jnp.arange(seq_len, dtype=jnp.float32)[:, None]
    div = jnp.power(10000.0, jnp.arange(0, H, 2, dtype=jnp.float32) / H)
    ang = pos / div
    P = jnp.zeros((seq_len, H), jnp.float32)
    P = P.at[:, 0::2].set(jnp.sin(ang))
    P = P.at[:, 1::2].set(jnp.cos(ang))
    return P


def _pack_mha(attn_list, heads):
    def one(p):
        H = p["Wq"].shape[0]
        d = H // heads
        w_in = lambda w: w.reshape(H, heads, d).transpose(1, 0, 2)   # (heads, H, d)
        b_in = lambda v: v.reshape(heads, 1, d)                       # (heads, 1, d)
        w_qkv = jnp.concatenate([w_in(p["Wq"]), w_in(p["Wk"]), w_in(p["Wv"])], 0)
        b_qkv = jnp.concatenate([b_in(p["bq"]), b_in(p["bk"]), b_in(p["bv"])], 0)
        return w_qkv, b_qkv, p["Wo"].reshape(heads, d, H), p["bo"][None, :]
    per_layer = [one(p) for p in attn_list]
    return tuple(jnp.stack(x) for x in zip(*per_layer))


def _stack_vec(layers, key):
    return jnp.stack([lp[key][None, :] for lp in layers])   # (L, 1, feat)


def pack_encoder_params(params, heads):
    lps = params["layers"]
    w_qkv, b_qkv, w_o, b_o = _pack_mha([lp["attn"] for lp in lps], heads)
    return dict(
        W_emb=params["W_emb"], b_emb=params["b_emb"][None, :],
        Wattn=w_qkv, battn=b_qkv, Wo=w_o, bo=b_o,
        W1=jnp.stack([lp["ffn_W1"] for lp in lps]), b1=_stack_vec(lps, "ffn_b1"),
        W2=jnp.stack([lp["ffn_W2"] for lp in lps]), b2=_stack_vec(lps, "ffn_b2"),
        ln1_g=_stack_vec(lps, "ln1_g"), ln1_b=_stack_vec(lps, "ln1_b"),
        ln2_g=_stack_vec(lps, "ln2_g"), ln2_b=_stack_vec(lps, "ln2_b"))


def pack_decoder_params(params, heads):
    lps = params["layers"]
    w1_qkv, b1_qkv, w1_o, b1_o = _pack_mha([lp["attn1"] for lp in lps], heads)
    w2_qkv, b2_qkv, w2_o, b2_o = _pack_mha([lp["attn2"] for lp in lps], heads)
    return dict(
        W_emb=params["W_emb"], b_emb=params["b_emb"][None, :],
        W_out=params["W_out"], b_out=params["b_out"][None, :],
        Wattn1=w1_qkv, battn1=b1_qkv, Wo1=w1_o, bo1=b1_o,
        Wattn2=w2_qkv, battn2=b2_qkv, Wo2=w2_o, bo2=b2_o,
        W1=jnp.stack([lp["ffn_W1"] for lp in lps]), b1=_stack_vec(lps, "ffn_b1"),
        W2=jnp.stack([lp["ffn_W2"] for lp in lps]), b2=_stack_vec(lps, "ffn_b2"),
        ln1_g=_stack_vec(lps, "ln1_g"), ln1_b=_stack_vec(lps, "ln1_b"),
        ln2_g=_stack_vec(lps, "ln2_g"), ln2_b=_stack_vec(lps, "ln2_b"),
        ln3_g=_stack_vec(lps, "ln3_g"), ln3_b=_stack_vec(lps, "ln3_b"))


# ----------------------------------------------------------------------------
# Pallas wrappers (one pallas_call per stack)
# ----------------------------------------------------------------------------

def transformer_encoder_pallas(params, src, valid_lens, cfg):
    B, Ts, _ = src.shape
    H, heads, L = cfg["num_hiddens"], cfg["num_heads"], cfg["num_layers"]
    pk = pack_encoder_params(params, heads)
    pe = positional_encoding(Ts, H)
    operands = [src, pe, pk["W_emb"], pk["b_emb"],
                pk["Wattn"], pk["battn"], pk["Wo"], pk["bo"],
                pk["W1"], pk["b1"], pk["W2"], pk["b2"],
                pk["ln1_g"], pk["ln1_b"], pk["ln2_g"], pk["ln2_b"]]
    specs = [_spec_batch(src), _spec_const(pe), _spec_const(pk["W_emb"]),
             _spec_const(pk["b_emb"]),
             _spec_layer(pk["Wattn"]), _spec_layer(pk["battn"]),
             _spec_layer(pk["Wo"]), _spec_layer(pk["bo"]),
             _spec_layer(pk["W1"]), _spec_layer(pk["b1"]),
             _spec_layer(pk["W2"]), _spec_layer(pk["b2"]),
             _spec_layer(pk["ln1_g"]), _spec_layer(pk["ln1_b"]),
             _spec_layer(pk["ln2_g"]), _spec_layer(pk["ln2_b"])]
    return pl.pallas_call(
        functools.partial(_encoder_kernel, heads=heads,
                          scale_emb=math.sqrt(H), eps=1e-5),
        out_shape=jax.ShapeDtypeStruct((B, Ts, H), jnp.float32),
        grid_spec=pltpu.PrefetchScalarGridSpec(
            num_scalar_prefetch=1, grid=(B, L),
            in_specs=specs,
            out_specs=pl.BlockSpec((1, Ts, H), lambda b, l, *_: (b, 0, 0)),
            scratch_shapes=[pltpu.VMEM((Ts, H), jnp.float32)]),
        compiler_params=pltpu.CompilerParams(
            dimension_semantics=("parallel", "arbitrary")),
    )(valid_lens, *operands)


def transformer_decoder_pallas(params, tgt, enc_out, enc_valid_lens, cfg):
    B, S, Din = tgt.shape
    H, heads, L = cfg["num_hiddens"], cfg["num_heads"], cfg["num_layers"]
    pk = pack_decoder_params(params, heads)
    pe = positional_encoding(S, H)
    operands = [tgt, pe, enc_out, pk["W_emb"], pk["b_emb"], pk["W_out"], pk["b_out"],
                pk["Wattn1"], pk["battn1"], pk["Wo1"], pk["bo1"],
                pk["Wattn2"], pk["battn2"], pk["Wo2"], pk["bo2"],
                pk["W1"], pk["b1"], pk["W2"], pk["b2"],
                pk["ln1_g"], pk["ln1_b"], pk["ln2_g"], pk["ln2_b"],
                pk["ln3_g"], pk["ln3_b"]]
    specs = [_spec_batch(tgt), _spec_const(pe), _spec_batch(enc_out),
             _spec_const(pk["W_emb"]), _spec_const(pk["b_emb"]),
             _spec_const(pk["W_out"]), _spec_const(pk["b_out"]),
             _spec_layer(pk["Wattn1"]), _spec_layer(pk["battn1"]),
             _spec_layer(pk["Wo1"]), _spec_layer(pk["bo1"]),
             _spec_layer(pk["Wattn2"]), _spec_layer(pk["battn2"]),
             _spec_layer(pk["Wo2"]), _spec_layer(pk["bo2"]),
             _spec_layer(pk["W1"]), _spec_layer(pk["b1"]),
             _spec_layer(pk["W2"]), _spec_layer(pk["b2"]),
             _spec_layer(pk["ln1_g"]), _spec_layer(pk["ln1_b"]),
             _spec_layer(pk["ln2_g"]), _spec_layer(pk["ln2_b"]),
             _spec_layer(pk["ln3_g"]), _spec_layer(pk["ln3_b"])]
    return pl.pallas_call(
        functools.partial(_decoder_kernel, heads=heads,
                          scale_emb=math.sqrt(H), eps=1e-5),
        out_shape=jax.ShapeDtypeStruct((B, S, Din), jnp.float32),
        grid_spec=pltpu.PrefetchScalarGridSpec(
            num_scalar_prefetch=1, grid=(B, L),
            in_specs=specs,
            out_specs=pl.BlockSpec((1, S, Din), lambda b, l, *_: (b, 0, 0)),
            scratch_shapes=[pltpu.VMEM((S, H), jnp.float32)]),
        compiler_params=pltpu.CompilerParams(
            dimension_semantics=("parallel", "arbitrary")),
    )(enc_valid_lens, *operands)


# ----------------------------------------------------------------------------
# Pure-JAX reference (correctness check)
# ----------------------------------------------------------------------------

def _ref_layernorm(z, g, b):
    mu = z.mean(-1, keepdims=True)
    var = ((z - mu) ** 2).mean(-1, keepdims=True)
    return (z - mu) / jnp.sqrt(var + 1e-5) * g + b


def _ref_mha(p, Xq, Xkv, mask, heads):
    B, Tq, H = Xq.shape
    d = H // heads
    q = Xq @ p["Wq"] + p["bq"]
    k = Xkv @ p["Wk"] + p["bk"]
    v = Xkv @ p["Wv"] + p["bv"]
    split = lambda t: t.reshape(B, -1, heads, d).transpose(0, 2, 1, 3)
    s = jnp.einsum('bhqd,bhkd->bhqk', split(q), split(k)) / math.sqrt(d)
    s = jnp.where(mask, s, -1e6)
    a = jax.nn.softmax(s, axis=-1)
    o = jnp.einsum('bhqk,bhkd->bhqd', a, split(v))
    o = o.transpose(0, 2, 1, 3).reshape(B, Tq, H)
    return o @ p["Wo"] + p["bo"]


def encoder_forward_ref(params, src, valid_lens, cfg):
    _, Ts, _ = src.shape
    H, heads = cfg["num_hiddens"], cfg["num_heads"]
    X = (src @ params["W_emb"] + params["b_emb"]) * math.sqrt(H) \
        + positional_encoding(Ts, H)[None]
    key_mask = (jnp.arange(Ts)[None, :] < valid_lens[:, None])[:, None, None, :]
    for lp in params["layers"]:
        Y = _ref_mha(lp["attn"], X, X, key_mask, heads)
        Z1 = _ref_layernorm(X + Y, lp["ln1_g"], lp["ln1_b"])
        Y2 = jnp.maximum(Z1 @ lp["ffn_W1"] + lp["ffn_b1"], 0.0) @ lp["ffn_W2"] \
            + lp["ffn_b2"]
        X = _ref_layernorm(Z1 + Y2, lp["ln2_g"], lp["ln2_b"])
    return X


def decoder_forward_ref(params, tgt, enc_out, enc_valid_lens, cfg):
    _, S, _ = tgt.shape
    Te = enc_out.shape[1]
    H, heads = cfg["num_hiddens"], cfg["num_heads"]
    X = (tgt @ params["W_emb"] + params["b_emb"]) * math.sqrt(H) \
        + positional_encoding(S, H)[None]
    causal = (jnp.arange(S)[None, :] <= jnp.arange(S)[:, None])[None, None]
    cross = (jnp.arange(Te)[None, :] < enc_valid_lens[:, None])[:, None, None, :]
    for lp in params["layers"]:
        Y = _ref_mha(lp["attn1"], X, X, causal, heads)
        Z1 = _ref_layernorm(X + Y, lp["ln1_g"], lp["ln1_b"])
        Y2 = _ref_mha(lp["attn2"], Z1, enc_out, cross, heads)
        Z2 = _ref_layernorm(Z1 + Y2, lp["ln2_g"], lp["ln2_b"])
        Y3 = jnp.maximum(Z2 @ lp["ffn_W1"] + lp["ffn_b1"], 0.0) @ lp["ffn_W2"] \
            + lp["ffn_b2"]
        X = _ref_layernorm(Z2 + Y3, lp["ln3_g"], lp["ln3_b"])
    return jax.nn.softmax(X @ params["W_out"] + params["b_out"], axis=-1)


def encoder_decoder_forward(enc_params, dec_params, src, tgt, src_valid_lens,
                            cfg, use_pallas=True):
    """EncoderDecoder.forward: encoder -> decoder.init_state -> decoder, output only."""
    if use_pallas:
        enc_out = transformer_encoder_pallas(enc_params, src, src_valid_lens, cfg)
        return transformer_decoder_pallas(dec_params, tgt, enc_out,
                                          src_valid_lens, cfg)
    enc_out = encoder_forward_ref(enc_params, src, src_valid_lens, cfg)
    return decoder_forward_ref(dec_params, tgt, enc_out, src_valid_lens, cfg)


# ----------------------------------------------------------------------------
# Deterministic parameter init
# ----------------------------------------------------------------------------

def _dense_init(key, fan_in, fan_out):
    k1, k2 = jax.random.split(key)
    lim = 1.0 / math.sqrt(fan_in)
    return (jax.random.uniform(k1, (fan_in, fan_out), jnp.float32, -lim, lim),
            jax.random.uniform(k2, (fan_out,), jnp.float32, -lim, lim))


def _init_attn(key, H):
    ks = jax.random.split(key, 4)
    Wq, bq = _dense_init(ks[0], H, H)
    Wk, bk = _dense_init(ks[1], H, H)
    Wv, bv = _dense_init(ks[2], H, H)
    Wo, bo = _dense_init(ks[3], H, H)
    return dict(Wq=Wq, bq=bq, Wk=Wk, bk=bk, Wv=Wv, bv=bv, Wo=Wo, bo=bo)


def init_encoder_params(key, cfg):
    Din, H, F, L = (cfg["input_size"], cfg["num_hiddens"],
                    cfg["ffn_num_hiddens"], cfg["num_layers"])
    keys = jax.random.split(key, 1 + L)
    W_emb, b_emb = _dense_init(keys[0], Din, H)
    layers = []
    for i in range(L):
        ks = jax.random.split(keys[1 + i], 3)
        W1, b1 = _dense_init(ks[1], H, F)
        W2, b2 = _dense_init(ks[2], F, H)
        layers.append(dict(
            attn=_init_attn(ks[0], H),
            ffn_W1=W1, ffn_b1=b1, ffn_W2=W2, ffn_b2=b2,
            ln1_g=jnp.ones((H,), jnp.float32), ln1_b=jnp.zeros((H,), jnp.float32),
            ln2_g=jnp.ones((H,), jnp.float32), ln2_b=jnp.zeros((H,), jnp.float32)))
    return dict(W_emb=W_emb, b_emb=b_emb, layers=layers)


def init_decoder_params(key, cfg):
    Din, H, F, L = (cfg["input_size"], cfg["num_hiddens"],
                    cfg["ffn_num_hiddens"], cfg["num_layers"])
    keys = jax.random.split(key, 2 + L)
    W_emb, b_emb = _dense_init(keys[0], Din, H)
    W_out, b_out = _dense_init(keys[1], H, Din)
    layers = []
    for i in range(L):
        ks = jax.random.split(keys[2 + i], 4)
        W1, b1 = _dense_init(ks[2], H, F)
        W2, b2 = _dense_init(ks[3], F, H)
        layers.append(dict(
            attn1=_init_attn(ks[0], H), attn2=_init_attn(ks[1], H),
            ffn_W1=W1, ffn_b1=b1, ffn_W2=W2, ffn_b2=b2,
            ln1_g=jnp.ones((H,), jnp.float32), ln1_b=jnp.zeros((H,), jnp.float32),
            ln2_g=jnp.ones((H,), jnp.float32), ln2_b=jnp.zeros((H,), jnp.float32),
            ln3_g=jnp.ones((H,), jnp.float32), ln3_b=jnp.zeros((H,), jnp.float32)))
    return dict(W_emb=W_emb, b_emb=b_emb, W_out=W_out, b_out=b_out, layers=layers)


# ----------------------------------------------------------------------------

if __name__ == "__main__":
    cfg = dict(input_size=16, num_layers=2, num_hiddens=32, num_heads=4,
               ffn_num_hiddens=64)
    B, Ts, S = 2, 8, 8

    key = jax.random.PRNGKey(0)
    k_ep, k_dp, k_src, k_tgt = jax.random.split(key, 4)
    enc_params = init_encoder_params(k_ep, cfg)
    dec_params = init_decoder_params(k_dp, cfg)
    src = jax.random.normal(k_src, (B, Ts, cfg["input_size"]), jnp.float32)
    tgt = jax.random.normal(k_tgt, (B, S, cfg["input_size"]), jnp.float32)
    src_valid_lens = jnp.array([8, 6], jnp.int32)

    out = encoder_decoder_forward(enc_params, dec_params, src, tgt,
                                  src_valid_lens, cfg, use_pallas=True)
    out = jax.block_until_ready(out)

    out_ref = encoder_decoder_forward(enc_params, dec_params, src, tgt,
                                      src_valid_lens, cfg, use_pallas=False)
    assert out.shape == (B, S, cfg["input_size"])
    err = float(jnp.max(jnp.abs(out - out_ref)))
    assert err < 2e-4, f"max abs err vs reference: {err}"
    print("KERNEL_OK")
</pallas_src>

<mosaic_0001>
module attributes {stable_mosaic.version = 11 : i64} {
  func.func @_encoder_kernel(%arg0: i32, %arg1: i32, %arg2: memref<2xi32, #tpu.memory_space<smem>>, %arg3: memref<1x8x16xf32, #tpu.memory_space<vmem>>, %arg4: memref<8x32xf32, #tpu.memory_space<vmem>>, %arg5: memref<16x32xf32, #tpu.memory_space<vmem>>, %arg6: memref<1x32xf32, #tpu.memory_space<vmem>>, %arg7: memref<1x12x32x8xf32, #tpu.memory_space<vmem>>, %arg8: memref<1x12x1x8xf32, #tpu.memory_space<vmem>>, %arg9: memref<1x4x8x32xf32, #tpu.memory_space<vmem>>, %arg10: memref<1x1x32xf32, #tpu.memory_space<vmem>>, %arg11: memref<1x32x64xf32, #tpu.memory_space<vmem>>, %arg12: memref<1x1x64xf32, #tpu.memory_space<vmem>>, %arg13: memref<1x64x32xf32, #tpu.memory_space<vmem>>, %arg14: memref<1x1x32xf32, #tpu.memory_space<vmem>>, %arg15: memref<1x1x32xf32, #tpu.memory_space<vmem>>, %arg16: memref<1x1x32xf32, #tpu.memory_space<vmem>>, %arg17: memref<1x1x32xf32, #tpu.memory_space<vmem>>, %arg18: memref<1x1x32xf32, #tpu.memory_space<vmem>>, %arg19: memref<1x8x32xf32, #tpu.memory_space<vmem>>, %arg20: memref<8x32xf32, #tpu.memory_space<vmem>>) attributes {dimension_semantics = [#tpu.dimension_semantics<parallel>, #tpu.dimension_semantics<arbitrary>], iteration_bounds = array<i64: 2, 2>, scalar_prefetch = 1 : i64, scratch_operands = 1 : i64, tpu.core_type = #tpu.core_type<tc>, window_params = [{transform_indices = @transform_0, window_bounds = array<i64: 1, 8, 16>}, {pipeline_mode = #tpu.pipeline_mode<synchronous>, transform_indices = @transform_1, window_bounds = array<i64: 8, 32>}, {pipeline_mode = #tpu.pipeline_mode<synchronous>, transform_indices = @transform_2, window_bounds = array<i64: 16, 32>}, {pipeline_mode = #tpu.pipeline_mode<synchronous>, transform_indices = @transform_3, window_bounds = array<i64: 1, 32>}, {transform_indices = @transform_4, window_bounds = array<i64: 1, 12, 32, 8>}, {transform_indices = @transform_5, window_bounds = array<i64: 1, 12, 1, 8>}, {transform_indices = @transform_6, window_bounds = array<i64: 1, 4, 8, 32>}, {transform_indices = @transform_7, window_bounds = array<i64: 1, 1, 32>}, {transform_indices = @transform_8, window_bounds = array<i64: 1, 32, 64>}, {transform_indices = @transform_9, window_bounds = array<i64: 1, 1, 64>}, {transform_indices = @transform_10, window_bounds = array<i64: 1, 64, 32>}, {transform_indices = @transform_11, window_bounds = array<i64: 1, 1, 32>}, {transform_indices = @transform_12, window_bounds = array<i64: 1, 1, 32>}, {transform_indices = @transform_13, window_bounds = array<i64: 1, 1, 32>}, {transform_indices = @transform_14, window_bounds = array<i64: 1, 1, 32>}, {transform_indices = @transform_15, window_bounds = array<i64: 1, 1, 32>}, {transform_indices = @transform_16, window_bounds = array<i64: 1, 8, 32>}]} {
    %c0_i32 = arith.constant 0 : i32
    %0 = arith.cmpi eq, %arg1, %c0_i32 : i32
    %1 = arith.extui %0 : i1 to i32
    %c0_i32_0 = arith.constant 0 : i32
    %2 = arith.cmpi ne, %1, %c0_i32_0 : i32
    scf.if %2 {
      %c0_97 = arith.constant 0 : index
      %c0_98 = arith.constant 0 : index
      %c0_99 = arith.constant 0 : index
      %258 = vector.load %arg3[%c0_97, %c0_98, %c0_99] : memref<1x8x16xf32, #tpu.memory_space<vmem>>, vector<1x8x16xf32>
      %259 = vector.shape_cast %258 : vector<1x8x16xf32> to vector<8x16xf32>
      %c0_100 = arith.constant 0 : index
      %c0_101 = arith.constant 0 : index
      %260 = vector.load %arg5[%c0_100, %c0_101] : memref<16x32xf32, #tpu.memory_space<vmem>>, vector<16x32xf32>
      %cst_102 = arith.constant dense<0.000000e+00> : vector<8x32xf32>
      %261 = tpu.matmul %259, %260, %cst_102 {dimension_numbers = #tpu.dot_dimension_numbers<[1], [0], [0], [1], [0, 0, 1, 1], [], []>} : vector<8x16xf32>, vector<16x32xf32>, vector<8x32xf32> -> vector<8x32xf32>
      %c0_103 = arith.constant 0 : index
      %c0_104 = arith.constant 0 : index
      %262 = vector.load %arg6[%c0_103, %c0_104] : memref<1x32xf32, #tpu.memory_space<vmem>>, vector<1x32xf32>
      %263 = vector.broadcast %262 : vector<1x32xf32> to vector<8x32xf32>
      %264 = arith.addf %261, %263 : vector<8x32xf32>
      %cst_105 = arith.constant 5.65685415 : f32
      %265 = vector.broadcast %cst_105 : f32 to vector<8x32xf32>
      %266 = arith.mulf %264, %265 : vector<8x32xf32>
      %c0_106 = arith.constant 0 : index
      %c0_107 = arith.constant 0 : index
      %267 = vector.load %arg4[%c0_106, %c0_107] : memref<8x32xf32, #tpu.memory_space<vmem>>, vector<8x32xf32>
      %268 = arith.addf %266, %267 : vector<8x32xf32>
      %c0_108 = arith.constant 0 : index
      %c0_109 = arith.constant 0 : index
      %269 = vector.load %arg20[%c0_108, %c0_109] : memref<8x32xf32, #tpu.memory_space<vmem>>, vector<8x32xf32>
      tpu.vector_store %arg20[%c0_108, %c0_109], %268 {strides = array<i32>} : memref<8x32xf32, #tpu.memory_space<vmem>>, vector<8x32xf32>,
    } else {
    }
    %c0 = arith.constant 0 : index
    %c0_1 = arith.constant 0 : index
    %3 = vector.load %arg20[%c0, %c0_1] : memref<8x32xf32, #tpu.memory_space<vmem>>, vector<8x32xf32>
    %4 = tpu.iota {dimensions = array<i32: 1>} : vector<8x8xi32>
    %5 = arith.index_cast %arg0 : i32 to index
    %6 = memref.load %arg2[%5] : memref<2xi32, #tpu.memory_space<smem>>
    %7 = vector.broadcast %6 : i32 to vector<8x8xi32>
    %8 = arith.cmpi slt, %4, %7 : vector<8x8xi32>
    %c0_2 = arith.constant 0 : index
    %c0_3 = arith.constant 0 : index
    %c0_4 = arith.constant 0 : index
    %c0_5 = arith.constant 0 : index
    %9 = vector.load %arg7[%c0_2, %c0_3, %c0_4, %c0_5] : memref<1x12x32x8xf32, #tpu.memory_space<vmem>>, vector<1x12x32x8xf32>
    %10 = vector.shape_cast %9 : vector<1x12x32x8xf32> to vector<12x32x8xf32>
    %c0_6 = arith.constant 0 : index
    %c0_7 = arith.constant 0 : index
    %c0_8 = arith.constant 0 : index
    %c0_9 = arith.constant 0 : index
    %11 = vector.load %arg8[%c0_6, %c0_7, %c0_8, %c0_9] : memref<1x12x1x8xf32, #tpu.memory_space<vmem>>, vector<1x12x1x8xf32>
    %12 = vector.shape_cast %11 : vector<1x12x1x8xf32> to vector<12x1x8xf32>
    %c0_10 = arith.constant 0 : index
    %c0_11 = arith.constant 0 : index
    %c0_12 = arith.constant 0 : index
    %c0_13 = arith.constant 0 : index
    %13 = vector.load %arg9[%c0_10, %c0_11, %c0_12, %c0_13] : memref<1x4x8x32xf32, #tpu.memory_space<vmem>>, vector<1x4x8x32xf32>
    %14 = vector.shape_cast %13 : vector<1x4x8x32xf32> to vector<4x8x32xf32>
    %c0_14 = arith.constant 0 : index
    %c0_15 = arith.constant 0 : index
    %c0_16 = arith.constant 0 : index
    %15 = vector.load %arg10[%c0_14, %c0_15, %c0_16] : memref<1x1x32xf32, #tpu.memory_space<vmem>>, vector<1x1x32xf32>
    %16 = vector.shape_cast %15 : vector<1x1x32xf32> to vector<1x32xf32>
    %cst = arith.constant 0.000000e+00 : f32
    %17 = vector.broadcast %cst : f32 to vector<8x32xf32>
    %18 = vector.extract_strided_slice %10 {offsets = [0, 0, 0], sizes = [1, 32, 8], strides = [1, 1, 1]} : vector<12x32x8xf32> to vector<1x32x8xf32>
    %19 = vector.shape_cast %18 : vector<1x32x8xf32> to vector<32x8xf32>
    %cst_17 = arith.constant dense<0.000000e+00> : vector<8x8xf32>
    %20 = tpu.matmul %3, %19, %cst_17 {dimension_numbers = #tpu.dot_dimension_numbers<[1], [0], [0], [1], [0, 0, 1, 1], [], []>} : vector<8x32xf32>, vector<32x8xf32>, vector<8x8xf32> -> vector<8x8xf32>
    %21 = vector.extract_strided_slice %12 {offsets = [0, 0, 0], sizes = [1, 1, 8], strides = [1, 1, 1]} : vector<12x1x8xf32> to vector<1x1x8xf32>
    %22 = vector.shape_cast %21 : vector<1x1x8xf32> to vector<1x8xf32>
    %23 = vector.broadcast %22 : vector<1x8xf32> to vector<8x8xf32>
    %24 = arith.addf %20, %23 : vector<8x8xf32>
    %25 = vector.extract_strided_slice %10 {offsets = [4, 0, 0], sizes = [1, 32, 8], strides = [1, 1, 1]} : vector<12x32x8xf32> to vector<1x32x8xf32>
    %26 = vector.shape_cast %25 : vector<1x32x8xf32> to vector<32x8xf32>
    %cst_18 = arith.constant dense<0.000000e+00> : vector<8x8xf32>
    %27 = tpu.matmul %3, %26, %cst_18 {dimension_numbers = #tpu.dot_dimension_numbers<[1], [0], [0], [1], [0, 0, 1, 1], [], []>} : vector<8x32xf32>, vector<32x8xf32>, vector<8x8xf32> -> vector<8x8xf32>
    %28 = vector.extract_strided_slice %12 {offsets = [4, 0, 0], sizes = [1, 1, 8], strides = [1, 1, 1]} : vector<12x1x8xf32> to vector<1x1x8xf32>
    %29 = vector.shape_cast %28 : vector<1x1x8xf32> to vector<1x8xf32>
    %30 = vector.broadcast %29 : vector<1x8xf32> to vector<8x8xf32>
    %31 = arith.addf %27, %30 : vector<8x8xf32>
    %32 = vector.extract_strided_slice %10 {offsets = [8, 0, 0], sizes = [1, 32, 8], strides = [1, 1, 1]} : vector<12x32x8xf32> to vector<1x32x8xf32>
    %33 = vector.shape_cast %32 : vector<1x32x8xf32> to vector<32x8xf32>
    %cst_19 = arith.constant dense<0.000000e+00> : vector<8x8xf32>
    %34 = tpu.matmul %3, %33, %cst_19 {dimension_numbers = #tpu.dot_dimension_numbers<[1], [0], [0], [1], [0, 0, 1, 1], [], []>} : vector<8x32xf32>, vector<32x8xf32>, vector<8x8xf32> -> vector<8x8xf32>
    %35 = vector.extract_strided_slice %12 {offsets = [8, 0, 0], sizes = [1, 1, 8], strides = [1, 1, 1]} : vector<12x1x8xf32> to vector<1x1x8xf32>
    %36 = vector.shape_cast %35 : vector<1x1x8xf32> to vector<1x8xf32>
    %37 = vector.broadcast %36 : vector<1x8xf32> to vector<8x8xf32>
    %38 = arith.addf %34, %37 : vector<8x8xf32>
    %cst_20 = arith.constant dense<0.000000e+00> : vector<8x8xf32>
    %39 = tpu.matmul %24, %31, %cst_20 {dimension_numbers = #tpu.dot_dimension_numbers<[1], [1], [0], [0], [0, 0, 1, 0], [], []>} : vector<8x8xf32>, vector<8x8xf32>, vector<8x8xf32> -> vector<8x8xf32>
    %cst_21 = arith.constant 0.353553385 : f32
    %40 = vector.broadcast %cst_21 : f32 to vector<8x8xf32>
    %41 = arith.mulf %39, %40 : vector<8x8xf32>
    %cst_22 = arith.constant -1.000000e+06 : f32
    %42 = vector.broadcast %cst_22 : f32 to vector<8x8xf32>
    %43 = arith.select %8, %41, %42 : vector<8x8xi1>, vector<8x8xf32>
    %cst_23 = arith.constant dense<0xFF800000> : vector<8xf32>
    %44 = vector.multi_reduction <maximumf>, %43, %cst_23 [1] : vector<8x8xf32> to vector<8xf32>
    %45 = vector.shape_cast %44 : vector<8xf32> to vector<8x1xf32>
    %46 = vector.broadcast %45 : vector<8x1xf32> to vector<8x8xf32>
    %47 = arith.subf %43, %46 : vector<8x8xf32>
    %48 = math.exp %47 : vector<8x8xf32>
    %cst_24 = arith.constant dense<0.000000e+00> : vector<8xf32>
    %49 = vector.multi_reduction <add>, %48, %cst_24 [1] : vector<8x8xf32> to vector<8xf32>
    %50 = vector.shape_cast %49 : vector<8xf32> to vector<8x1xf32>
    %51 = tpu.reciprocal %50 : vector<8x1xf32> -> vector<8x1xf32>
    %52 = vector.broadcast %51 : vector<8x1xf32> to vector<8x8xf32>
    %53 = arith.mulf %48, %52 : vector<8x8xf32>
    %cst_25 = arith.constant dense<0.000000e+00> : vector<8x8xf32>
    %54 = tpu.matmul %53, %38, %cst_25 {dimension_numbers = #tpu.dot_dimension_numbers<[1], [0], [0], [1], [0, 0, 1, 1], [], []>} : vector<8x8xf32>, vector<8x8xf32>, vector<8x8xf32> -> vector<8x8xf32>
    %55 = vector.extract_strided_slice %14 {offsets = [0, 0, 0], sizes = [1, 8, 32], strides = [1, 1, 1]} : vector<4x8x32xf32> to vector<1x8x32xf32>
    %56 = vector.shape_cast %55 : vector<1x8x32xf32> to vector<8x32xf32>
    %cst_26 = arith.constant dense<0.000000e+00> : vector<8x32xf32>
    %57 = tpu.matmul %54, %56, %cst_26 {dimension_numbers = #tpu.dot_dimension_numbers<[1], [0], [0], [1], [0, 0, 1, 1], [], []>} : vector<8x8xf32>, vector<8x32xf32>, vector<8x32xf32> -> vector<8x32xf32>
    %58 = arith.addf %17, %57 : vector<8x32xf32>
    %59 = vector.extract_strided_slice %10 {offsets = [1, 0, 0], sizes = [1, 32, 8], strides = [1, 1, 1]} : vector<12x32x8xf32> to vector<1x32x8xf32>
    %60 = vector.shape_cast %59 : vector<1x32x8xf32> to vector<32x8xf32>
    %cst_27 = arith.constant dense<0.000000e+00> : vector<8x8xf32>
    %61 = tpu.matmul %3, %60, %cst_27 {dimension_numbers = #tpu.dot_dimension_numbers<[1], [0], [0], [1], [0, 0, 1, 1], [], []>} : vector<8x32xf32>, vector<32x8xf32>, vector<8x8xf32> -> vector<8x8xf32>
    %62 = vector.extract_strided_slice %12 {offsets = [1, 0, 0], sizes = [1, 1, 8], strides = [1, 1, 1]} : vector<12x1x8xf32> to vector<1x1x8xf32>
    %63 = vector.shape_cast %62 : vector<1x1x8xf32> to vector<1x8xf32>
    %64 = vector.broadcast %63 : vector<1x8xf32> to vector<8x8xf32>
    %65 = arith.addf %61, %64 : vector<8x8xf32>
    %66 = vector.extract_strided_slice %10 {offsets = [5, 0, 0], sizes = [1, 32, 8], strides = [1, 1, 1]} : vector<12x32x8xf32> to vector<1x32x8xf32>
    %67 = vector.shape_cast %66 : vector<1x32x8xf32> to vector<32x8xf32>
    %cst_28 = arith.constant dense<0.000000e+00> : vector<8x8xf32>
    %68 = tpu.matmul %3, %67, %cst_28 {dimension_numbers = #tpu.dot_dimension_numbers<[1], [0], [0], [1], [0, 0, 1, 1], [], []>} : vector<8x32xf32>, vector<32x8xf32>, vector<8x8xf32> -> vector<8x8xf32>
    %69 = vector.extract_strided_slice %12 {offsets = [5, 0, 0], sizes = [1, 1, 8], strides = [1, 1, 1]} : vector<12x1x8xf32> to vector<1x1x8xf32>
    %70 = vector.shape_cast %69 : vector<1x1x8xf32> to vector<1x8xf32>
    %71 = vector.broadcast %70 : vector<1x8xf32> to vector<8x8xf32>
    %72 = arith.addf %68, %71 : vector<8x8xf32>
    %73 = vector.extract_strided_slice %10 {offsets = [9, 0, 0], sizes = [1, 32, 8], strides = [1, 1, 1]} : vector<12x32x8xf32> to vector<1x32x8xf32>
    %74 = vector.shape_cast %73 : vector<1x32x8xf32> to vector<32x8xf32>
    %cst_29 = arith.constant dense<0.000000e+00> : vector<8x8xf32>
    %75 = tpu.matmul %3, %74, %cst_29 {dimension_numbers = #tpu.dot_dimension_numbers<[1], [0], [0], [1], [0, 0, 1, 1], [], []>} : vector<8x32xf32>, vector<32x8xf32>, vector<8x8xf32> -> vector<8x8xf32>
    %76 = vector.extract_strided_slice %12 {offsets = [9, 0, 0], sizes = [1, 1, 8], strides = [1, 1, 1]} : vector<12x1x8xf32> to vector<1x1x8xf32>
    %77 = vector.shape_cast %76 : vector<1x1x8xf32> to vector<1x8xf32>
    %78 = vector.broadcast %77 : vector<1x8xf32> to vector<8x8xf32>
    %79 = arith.addf %75, %78 : vector<8x8xf32>
    %cst_30 = arith.constant dense<0.000000e+00> : vector<8x8xf32>
    %80 = tpu.matmul %65, %72, %cst_30 {dimension_numbers = #tpu.dot_dimension_numbers<[1], [1], [0], [0], [0, 0, 1, 0], [], []>} : vector<8x8xf32>, vector<8x8xf32>, vector<8x8xf32> -> vector<8x8xf32>
    %cst_31 = arith.constant 0.353553385 : f32
    %81 = vector.broadcast %cst_31 : f32 to vector<8x8xf32>
    %82 = arith.mulf %80, %81 : vector<8x8xf32>
    %cst_32 = arith.constant -1.000000e+06 : f32
    %83 = vector.broadcast %cst_32 : f32 to vector<8x8xf32>
    %84 = arith.select %8, %82, %83 : vector<8x8xi1>, vector<8x8xf32>
    %cst_33 = arith.constant dense<0xFF800000> : vector<8xf32>
    %85 = vector.multi_reduction <maximumf>, %84, %cst_33 [1] : vector<8x8xf32> to vector<8xf32>
    %86 = vector.shape_cast %85 : vector<8xf32> to vector<8x1xf32>
    %87 = vector.broadcast %86 : vector<8x1xf32> to vector<8x8xf32>
    %88 = arith.subf %84, %87 : vector<8x8xf32>
    %89 = math.exp %88 : vector<8x8xf32>
    %cst_34 = arith.constant dense<0.000000e+00> : vector<8xf32>
    %90 = vector.multi_reduction <add>, %89, %cst_34 [1] : vector<8x8xf32> to vector<8xf32>
    %91 = vector.shape_cast %90 : vector<8xf32> to vector<8x1xf32>
    %92 = tpu.reciprocal %91 : vector<8x1xf32> -> vector<8x1xf32>
    %93 = vector.broadcast %92 : vector<8x1xf32> to vector<8x8xf32>
    %94 = arith.mulf %89, %93 : vector<8x8xf32>
    %cst_35 = arith.constant dense<0.000000e+00> : vector<8x8xf32>
    %95 = tpu.matmul %94, %79, %cst_35 {dimension_numbers = #tpu.dot_dimension_numbers<[1], [0], [0], [1], [0, 0, 1, 1], [], []>} : vector<8x8xf32>, vector<8x8xf32>, vector<8x8xf32> -> vector<8x8xf32>
    %96 = vector.extract_strided_slice %14 {offsets = [1, 0, 0], sizes = [1, 8, 32], strides = [1, 1, 1]} : vector<4x8x32xf32> to vector<1x8x32xf32>
    %97 = vector.shape_cast %96 : vector<1x8x32xf32> to vector<8x32xf32>
    %cst_36 = arith.constant dense<0.000000e+00> : vector<8x32xf32>
    %98 = tpu.matmul %95, %97, %cst_36 {dimension_numbers = #tpu.dot_dimension_numbers<[1], [0], [0], [1], [0, 0, 1, 1], [], []>} : vector<8x8xf32>, vector<8x32xf32>, vector<8x32xf32> -> vector<8x32xf32>
    %99 = arith.addf %58, %98 : vector<8x32xf32>
    %100 = vector.extract_strided_slice %10 {offsets = [2, 0, 0], sizes = [1, 32, 8], strides = [1, 1, 1]} : vector<12x32x8xf32> to vector<1x32x8xf32>
    %101 = vector.shape_cast %100 : vector<1x32x8xf32> to vector<32x8xf32>
    %cst_37 = arith.constant dense<0.000000e+00> : vector<8x8xf32>
    %102 = tpu.matmul %3, %101, %cst_37 {dimension_numbers = #tpu.dot_dimension_numbers<[1], [0], [0], [1], [0, 0, 1, 1], [], []>} : vector<8x32xf32>, vector<32x8xf32>, vector<8x8xf32> -> vector<8x8xf32>
    %103 = vector.extract_strided_slice %12 {offsets = [2, 0, 0], sizes = [1, 1, 8], strides = [1, 1, 1]} : vector<12x1x8xf32> to vector<1x1x8xf32>
    %104 = vector.shape_cast %103 : vector<1x1x8xf32> to vector<1x8xf32>
    %105 = vector.broadcast %104 : vector<1x8xf32> to vector<8x8xf32>
    %106 = arith.addf %102, %105 : vector<8x8xf32>
    %107 = vector.extract_strided_slice %10 {offsets = [6, 0, 0], sizes = [1, 32, 8], strides = [1, 1, 1]} : vector<12x32x8xf32> to vector<1x32x8xf32>
    %108 = vector.shape_cast %107 : vector<1x32x8xf32> to vector<32x8xf32>
    %cst_38 = arith.constant dense<0.000000e+00> : vector<8x8xf32>
    %109 = tpu.matmul %3, %108, %cst_38 {dimension_numbers = #tpu.dot_dimension_numbers<[1], [0], [0], [1], [0, 0, 1, 1], [], []>} : vector<8x32xf32>, vector<32x8xf32>, vector<8x8xf32> -> vector<8x8xf32>
    %110 = vector.extract_strided_slice %12 {offsets = [6, 0, 0], sizes = [1, 1, 8], strides = [1, 1, 1]} : vector<12x1x8xf32> to vector<1x1x8xf32>
    %111 = vector.shape_cast %110 : vector<1x1x8xf32> to vector<1x8xf32>
    %112 = vector.broadcast %111 : vector<1x8xf32> to vector<8x8xf32>
    %113 = arith.addf %109, %112 : vector<8x8xf32>
    %114 = vector.extract_strided_slice %10 {offsets = [10, 0, 0], sizes = [1, 32, 8], strides = [1, 1, 1]} : vector<12x32x8xf32> to vector<1x32x8xf32>
    %115 = vector.shape_cast %114 : vector<1x32x8xf32> to vector<32x8xf32>
    %cst_39 = arith.constant dense<0.000000e+00> : vector<8x8xf32>
    %116 = tpu.matmul %3, %115, %cst_39 {dimension_numbers = #tpu.dot_dimension_numbers<[1], [0], [0], [1], [0, 0, 1, 1], [], []>} : vector<8x32xf32>, vector<32x8xf32>, vector<8x8xf32> -> vector<8x8xf32>
    %117 = vector.extract_strided_slice %12 {offsets = [10, 0, 0], sizes = [1, 1, 8], strides = [1, 1, 1]} : vector<12x1x8xf32> to vector<1x1x8xf32>
    %118 = vector.shape_cast %117 : vector<1x1x8xf32> to vector<1x8xf32>
    %119 = vector.broadcast %118 : vector<1x8xf32> to vector<8x8xf32>
    %120 = arith.addf %116, %119 : vector<8x8xf32>
    %cst_40 = arith.constant dense<0.000000e+00> : vector<8x8xf32>
    %121 = tpu.matmul %106, %113, %cst_40 {dimension_numbers = #tpu.dot_dimension_numbers<[1], [1], [0], [0], [0, 0, 1, 0], [], []>} : vector<8x8xf32>, vector<8x8xf32>, vector<8x8xf32> -> vector<8x8xf32>
    %cst_41 = arith.constant 0.353553385 : f32
    %122 = vector.broadcast %cst_41 : f32 to vector<8x8xf32>
    %123 = arith.mulf %121, %122 : vector<8x8xf32>
    %cst_42 = arith.constant -1.000000e+06 : f32
    %124 = vector.broadcast %cst_42 : f32 to vector<8x8xf32>
    %125 = arith.select %8, %123, %124 : vector<8x8xi1>, vector<8x8xf32>
    %cst_43 = arith.constant dense<0xFF800000> : vector<8xf32>
    %126 = vector.multi_reduction <maximumf>, %125, %cst_43 [1] : vector<8x8xf32> to vector<8xf32>
    %127 = vector.shape_cast %126 : vector<8xf32> to vector<8x1xf32>
    %128 = vector.broadcast %127 : vector<8x1xf32> to vector<8x8xf32>
    %129 = arith.subf %125, %128 : vector<8x8xf32>
    %130 = math.exp %129 : vector<8x8xf32>
    %cst_44 = arith.constant dense<0.000000e+00> : vector<8xf32>
    %131 = vector.multi_reduction <add>, %130, %cst_44 [1] : vector<8x8xf32> to vector<8xf32>
    %132 = vector.shape_cast %131 : vector<8xf32> to vector<8x1xf32>
    %133 = tpu.reciprocal %132 : vector<8x1xf32> -> vector<8x1xf32>
    %134 = vector.broadcast %133 : vector<8x1xf32> to vector<8x8xf32>
    %135 = arith.mulf %130, %134 : vector<8x8xf32>
    %cst_45 = arith.constant dense<0.000000e+00> : vector<8x8xf32>
    %136 = tpu.matmul %135, %120, %cst_45 {dimension_numbers = #tpu.dot_dimension_numbers<[1], [0], [0], [1], [0, 0, 1, 1], [], []>} : vector<8x8xf32>, vector<8x8xf32>, vector<8x8xf32> -> vector<8x8xf32>
    %137 = vector.extract_strided_slice %14 {offsets = [2, 0, 0], sizes = [1, 8, 32], strides = [1, 1, 1]} : vector<4x8x32xf32> to vector<1x8x32xf32>
    %138 = vector.shape_cast %137 : vector<1x8x32xf32> to vector<8x32xf32>
    %cst_46 = arith.constant dense<0.000000e+00> : vector<8x32xf32>
    %139 = tpu.matmul %136, %138, %cst_46 {dimension_numbers = #tpu.dot_dimension_numbers<[1], [0], [0], [1], [0, 0, 1, 1], [], []>} : vector<8x8xf32>, vector<8x32xf32>, vector<8x32xf32> -> vector<8x32xf32>
    %140 = arith.addf %99, %139 : vector<8x32xf32>
    %141 = vector.extract_strided_slice %10 {offsets = [3, 0, 0], sizes = [1, 32, 8], strides = [1, 1, 1]} : vector<12x32x8xf32> to vector<1x32x8xf32>
    %142 = vector.shape_cast %141 : vector<1x32x8xf32> to vector<32x8xf32>
    %cst_47 = arith.constant dense<0.000000e+00> : vector<8x8xf32>
    %143 = tpu.matmul %3, %142, %cst_47 {dimension_numbers = #tpu.dot_dimension_numbers<[1], [0], [0], [1], [0, 0, 1, 1], [], []>} : vector<8x32xf32>, vector<32x8xf32>, vector<8x8xf32> -> vector<8x8xf32>
    %144 = vector.extract_strided_slice %12 {offsets = [3, 0, 0], sizes = [1, 1, 8], strides = [1, 1, 1]} : vector<12x1x8xf32> to vector<1x1x8xf32>
    %145 = vector.shape_cast %144 : vector<1x1x8xf32> to vector<1x8xf32>
    %146 = vector.broadcast %145 : vector<1x8xf32> to vector<8x8xf32>
    %147 = arith.addf %143, %146 : vector<8x8xf32>
    %148 = vector.extract_strided_slice %10 {offsets = [7, 0, 0], sizes = [1, 32, 8], strides = [1, 1, 1]} : vector<12x32x8xf32> to vector<1x32x8xf32>
    %149 = vector.shape_cast %148 : vector<1x32x8xf32> to vector<32x8xf32>
    %cst_48 = arith.constant dense<0.000000e+00> : vector<8x8xf32>
    %150 = tpu.matmul %3, %149, %cst_48 {dimension_numbers = #tpu.dot_dimension_numbers<[1], [0], [0], [1], [0, 0, 1, 1], [], []>} : vector<8x32xf32>, vector<32x8xf32>, vector<8x8xf32> -> vector<8x8xf32>
    %151 = vector.extract_strided_slice %12 {offsets = [7, 0, 0], sizes = [1, 1, 8], strides = [1, 1, 1]} : vector<12x1x8xf32> to vector<1x1x8xf32>
    %152 = vector.shape_cast %151 : vector<1x1x8xf32> to vector<1x8xf32>
    %153 = vector.broadcast %152 : vector<1x8xf32> to vector<8x8xf32>
    %154 = arith.addf %150, %153 : vector<8x8xf32>
    %155 = vector.extract_strided_slice %10 {offsets = [11, 0, 0], sizes = [1, 32, 8], strides = [1, 1, 1]} : vector<12x32x8xf32> to vector<1x32x8xf32>
    %156 = vector.shape_cast %155 : vector<1x32x8xf32> to vector<32x8xf32>
    %cst_49 = arith.constant dense<0.000000e+00> : vector<8x8xf32>
    %157 = tpu.matmul %3, %156, %cst_49 {dimension_numbers = #tpu.dot_dimension_numbers<[1], [0], [0], [1], [0, 0, 1, 1], [], []>} : vector<8x32xf32>, vector<32x8xf32>, vector<8x8xf32> -> vector<8x8xf32>
    %158 = vector.extract_strided_slice %12 {offsets = [11, 0, 0], sizes = [1, 1, 8], strides = [1, 1, 1]} : vector<12x1x8xf32> to vector<1x1x8xf32>
    %159 = vector.shape_cast %158 : vector<1x1x8xf32> to vector<1x8xf32>
    %160 = vector.broadcast %159 : vector<1x8xf32> to vector<8x8xf32>
    %161 = arith.addf %157, %160 : vector<8x8xf32>
    %cst_50 = arith.constant dense<0.000000e+00> : vector<8x8xf32>
    %162 = tpu.matmul %147, %154, %cst_50 {dimension_numbers = #tpu.dot_dimension_numbers<[1], [1], [0], [0], [0, 0, 1, 0], [], []>} : vector<8x8xf32>, vector<8x8xf32>, vector<8x8xf32> -> vector<8x8xf32>
    %cst_51 = arith.constant 0.353553385 : f32
    %163 = vector.broadcast %cst_51 : f32 to vector<8x8xf32>
    %164 = arith.mulf %162, %163 : vector<8x8xf32>
    %cst_52 = arith.constant -1.000000e+06 : f32
    %165 = vector.broadcast %cst_52 : f32 to vector<8x8xf32>
    %166 = arith.select %8, %164, %165 : vector<8x8xi1>, vector<8x8xf32>
    %cst_53 = arith.constant dense<0xFF800000> : vector<8xf32>
    %167 = vector.multi_reduction <maximumf>, %166, %cst_53 [1] : vector<8x8xf32> to vector<8xf32>
    %168 = vector.shape_cast %167 : vector<8xf32> to vector<8x1xf32>
    %169 = vector.broadcast %168 : vector<8x1xf32> to vector<8x8xf32>
    %170 = arith.subf %166, %169 : vector<8x8xf32>
    %171 = math.exp %170 : vector<8x8xf32>
    %cst_54 = arith.constant dense<0.000000e+00> : vector<8xf32>
    %172 = vector.multi_reduction <add>, %171, %cst_54 [1] : vector<8x8xf32> to vector<8xf32>
    %173 = vector.shape_cast %172 : vector<8xf32> to vector<8x1xf32>
    %174 = tpu.reciprocal %173 : vector<8x1xf32> -> vector<8x1xf32>
    %175 = vector.broadcast %174 : vector<8x1xf32> to vector<8x8xf32>
    %176 = arith.mulf %171, %175 : vector<8x8xf32>
    %cst_55 = arith.constant dense<0.000000e+00> : vector<8x8xf32>
    %177 = tpu.matmul %176, %161, %cst_55 {dimension_numbers = #tpu.dot_dimension_numbers<[1], [0], [0], [1], [0, 0, 1, 1], [], []>} : vector<8x8xf32>, vector<8x8xf32>, vector<8x8xf32> -> vector<8x8xf32>
    %178 = vector.extract_strided_slice %14 {offsets = [3, 0, 0], sizes = [1, 8, 32], strides = [1, 1, 1]} : vector<4x8x32xf32> to vector<1x8x32xf32>
    %179 = vector.shape_cast %178 : vector<1x8x32xf32> to vector<8x32xf32>
    %cst_56 = arith.constant dense<0.000000e+00> : vector<8x32xf32>
    %180 = tpu.matmul %177, %179, %cst_56 {dimension_numbers = #tpu.dot_dimension_numbers<[1], [0], [0], [1], [0, 0, 1, 1], [], []>} : vector<8x8xf32>, vector<8x32xf32>, vector<8x32xf32> -> vector<8x32xf32>
    %181 = arith.addf %140, %180 : vector<8x32xf32>
    %182 = vector.broadcast %16 : vector<1x32xf32> to vector<8x32xf32>
    %183 = arith.addf %181, %182 : vector<8x32xf32>
    %184 = arith.addf %3, %183 : vector<8x32xf32>
    %c0_57 = arith.constant 0 : index
    %c0_58 = arith.constant 0 : index
    %c0_59 = arith.constant 0 : index
    %185 = vector.load %arg15[%c0_57, %c0_58, %c0_59] : memref<1x1x32xf32, #tpu.memory_space<vmem>>, vector<1x1x32xf32>
    %186 = vector.shape_cast %185 : vector<1x1x32xf32> to vector<1x32xf32>
    %c0_60 = arith.constant 0 : index
    %c0_61 = arith.constant 0 : index
    %c0_62 = arith.constant 0 : index
    %187 = vector.load %arg16[%c0_60, %c0_61, %c0_62] : memref<1x1x32xf32, #tpu.memory_space<vmem>>, vector<1x1x32xf32>
    %188 = vector.shape_cast %187 : vector<1x1x32xf32> to vector<1x32xf32>
    %cst_63 = arith.constant dense<0.000000e+00> : vector<8xf32>
    %189 = vector.multi_reduction <add>, %184, %cst_63 [1] : vector<8x32xf32> to vector<8xf32>
    %190 = vector.shape_cast %189 : vector<8xf32> to vector<8x1xf32>
    %cst_64 = arith.constant 3.200000e+01 : f32
    %191 = vector.broadcast %cst_64 : f32 to vector<8x1xf32>
    %192 = arith.divf %190, %191 : vector<8x1xf32>
    %193 = vector.broadcast %192 : vector<8x1xf32> to vector<8x32xf32>
    %194 = arith.subf %184, %193 : vector<8x32xf32>
    %195 = arith.mulf %194, %194 : vector<8x32xf32>
    %cst_65 = arith.constant dense<0.000000e+00> : vector<8xf32>
    %196 = vector.multi_reduction <add>, %195, %cst_65 [1] : vector<8x32xf32> to vector<8xf32>
    %197 = vector.shape_cast %196 : vector<8xf32> to vector<8x1xf32>
    %cst_66 = arith.constant 3.200000e+01 : f32
    %198 = vector.broadcast %cst_66 : f32 to vector<8x1xf32>
    %199 = arith.divf %197, %198 : vector<8x1xf32>
    %200 = vector.broadcast %192 : vector<8x1xf32> to vector<8x32xf32>
    %201 = arith.subf %184, %200 : vector<8x32xf32>
    %cst_67 = arith.constant 9.99999974E-6 : f32
    %202 = vector.broadcast %cst_67 : f32 to vector<8x1xf32>
    %203 = arith.addf %199, %202 : vector<8x1xf32>
    %204 = math.rsqrt %203 : vector<8x1xf32>
    %205 = vector.broadcast %204 : vector<8x1xf32> to vector<8x32xf32>
    %206 = arith.mulf %201, %205 : vector<8x32xf32>
    %207 = vector.broadcast %186 : vector<1x32xf32> to vector<8x32xf32>
    %208 = arith.mulf %206, %207 : vector<8x32xf32>
    %209 = vector.broadcast %188 : vector<1x32xf32> to vector<8x32xf32>
    %210 = arith.addf %208, %209 : vector<8x32xf32>
    %c0_68 = arith.constant 0 : index
    %c0_69 = arith.constant 0 : index
    %c0_70 = arith.constant 0 : index
    %211 = vector.load %arg11[%c0_68, %c0_69, %c0_70] : memref<1x32x64xf32, #tpu.memory_space<vmem>>, vector<1x32x64xf32>
    %212 = vector.shape_cast %211 : vector<1x32x64xf32> to vector<32x64xf32>
    %cst_71 = arith.constant dense<0.000000e+00> : vector<8x64xf32>
    %213 = tpu.matmul %210, %212, %cst_71 {dimension_numbers = #tpu.dot_dimension_numbers<[1], [0], [0], [1], [0, 0, 1, 1], [], []>} : vector<8x32xf32>, vector<32x64xf32>, vector<8x64xf32> -> vector<8x64xf32>
    %c0_72 = arith.constant 0 : index
    %c0_73 = arith.constant 0 : index
    %c0_74 = arith.constant 0 : index
    %214 = vector.load %arg12[%c0_72, %c0_73, %c0_74] : memref<1x1x64xf32, #tpu.memory_space<vmem>>, vector<1x1x64xf32>
    %215 = vector.shape_cast %214 : vector<1x1x64xf32> to vector<1x64xf32>
    %216 = vector.broadcast %215 : vector<1x64xf32> to vector<8x64xf32>
    %217 = arith.addf %213, %216 : vector<8x64xf32>
    %cst_75 = arith.constant 0.000000e+00 : f32
    %218 = vector.broadcast %cst_75 : f32 to vector<8x64xf32>
    %219 = arith.maximumf %217, %218 : vector<8x64xf32>
    %c0_76 = arith.constant 0 : index
    %c0_77 = arith.constant 0 : index
    %c0_78 = arith.constant 0 : index
    %220 = vector.load %arg13[%c0_76, %c0_77, %c0_78] : memref<1x64x32xf32, #tpu.memory_space<vmem>>, vector<1x64x32xf32>
    %221 = vector.shape_cast %220 : vector<1x64x32xf32> to vector<64x32xf32>
    %cst_79 = arith.constant dense<0.000000e+00> : vector<8x32xf32>
    %222 = tpu.matmul %219, %221, %cst_79 {dimension_numbers = #tpu.dot_dimension_numbers<[1], [0], [0], [1], [0, 0, 1, 1], [], []>} : vector<8x64xf32>, vector<64x32xf32>, vector<8x32xf32> -> vector<8x32xf32>
    %c0_80 = arith.constant 0 : index
    %c0_81 = arith.constant 0 : index
    %c0_82 = arith.constant 0 : index
    %223 = vector.load %arg14[%c0_80, %c0_81, %c0_82] : memref<1x1x32xf32, #tpu.memory_space<vmem>>, vector<1x1x32xf32>
    %224 = vector.shape_cast %223 : vector<1x1x32xf32> to vector<1x32xf32>
    %225 = vector.broadcast %224 : vector<1x32xf32> to vector<8x32xf32>
    %226 = arith.addf %222, %225 : vector<8x32xf32>
    %227 = arith.addf %210, %226 : vector<8x32xf32>
    %c0_83 = arith.constant 0 : index
    %c0_84 = arith.constant 0 : index
    %c0_85 = arith.constant 0 : index
    %228 = vector.load %arg17[%c0_83, %c0_84, %c0_85] : memref<1x1x32xf32, #tpu.memory_space<vmem>>, vector<1x1x32xf32>
    %229 = vector.shape_cast %228 : vector<1x1x32xf32> to vector<1x32xf32>
    %c0_86 = arith.constant 0 : index
    %c0_87 = arith.constant 0 : index
    %c0_88 = arith.constant 0 : index
    %230 = vector.load %arg18[%c0_86, %c0_87, %c0_88] : memref<1x1x32xf32, #tpu.memory_space<vmem>>, vector<1x1x32xf32>
    %231 = vector.shape_cast %230 : vector<1x1x32xf32> to vector<1x32xf32>
    %cst_89 = arith.constant dense<0.000000e+00> : vector<8xf32>
    %232 = vector.multi_reduction <add>, %227, %cst_89 [1] : vector<8x32xf32> to vector<8xf32>
    %233 = vector.shape_cast %232 : vector<8xf32> to vector<8x1xf32>
    %cst_90 = arith.constant 3.200000e+01 : f32
    %234 = vector.broadcast %cst_90 : f32 to vector<8x1xf32>
    %235 = arith.divf %233, %234 : vector<8x1xf32>
    %236 = vector.broadcast %235 : vector<8x1xf32> to vector<8x32xf32>
    %237 = arith.subf %227, %236 : vector<8x32xf32>
    %238 = arith.mulf %237, %237 : vector<8x32xf32>
    %cst_91 = arith.constant dense<0.000000e+00> : vector<8xf32>
    %239 = vector.multi_reduction <add>, %238, %cst_91 [1] : vector<8x32xf32> to vector<8xf32>
    %240 = vector.shape_cast %239 : vector<8xf32> to vector<8x1xf32>
    %cst_92 = arith.constant 3.200000e+01 : f32
    %241 = vector.broadcast %cst_92 : f32 to vector<8x1xf32>
    %242 = arith.divf %240, %241 : vector<8x1xf32>
    %243 = vector.broadcast %235 : vector<8x1xf32> to vector<8x32xf32>
    %244 = arith.subf %227, %243 : vector<8x32xf32>
    %cst_93 = arith.constant 9.99999974E-6 : f32
    %245 = vector.broadcast %cst_93 : f32 to vector<8x1xf32>
    %246 = arith.addf %242, %245 : vector<8x1xf32>
    %247 = math.rsqrt %246 : vector<8x1xf32>
    %248 = vector.broadcast %247 : vector<8x1xf32> to vector<8x32xf32>
    %249 = arith.mulf %244, %248 : vector<8x32xf32>
    %250 = vector.broadcast %229 : vector<1x32xf32> to vector<8x32xf32>
    %251 = arith.mulf %249, %250 : vector<8x32xf32>
    %252 = vector.broadcast %231 : vector<1x32xf32> to vector<8x32xf32>
    %253 = arith.addf %251, %252 : vector<8x32xf32>
    %c0_94 = arith.constant 0 : index
    %c0_95 = arith.constant 0 : index
    %254 = vector.load %arg20[%c0_94, %c0_95] : memref<8x32xf32, #tpu.memory_space<vmem>>, vector<8x32xf32>
    tpu.vector_store %arg20[%c0_94, %c0_95], %253 {strides = array<i32>} : memref<8x32xf32, #tpu.memory_space<vmem>>, vector<8x32xf32>,
    %c1_i32 = arith.constant 1 : i32
    %255 = arith.cmpi eq, %arg1, %c1_i32 : i32
    %256 = arith.extui %255 : i1 to i32
    %c0_i32_96 = arith.constant 0 : i32
    %257 = arith.cmpi ne, %256, %c0_i32_96 : i32
    scf.if %257 {
      %c0_97 = arith.constant 0 : index
      %c0_98 = arith.constant 0 : index
      %c0_99 = arith.constant 0 : index
      %258 = vector.load %arg19[%c0_97, %c0_98, %c0_99] : memref<1x8x32xf32, #tpu.memory_space<vmem>>, vector<1x8x32xf32>
      %259 = vector.shape_cast %258 : vector<1x8x32xf32> to vector<8x32xf32>
      %260 = vector.shape_cast %253 : vector<8x32xf32> to vector<1x8x32xf32>
      tpu.vector_store %arg19[%c0_97, %c0_98, %c0_99], %260 {strides = array<i32>} : memref<1x8x32xf32, #tpu.memory_space<vmem>>, vector<1x8x32xf32>,
    } else {
    }
    return
  }
  func.func @transform_0(%arg0: i32, %arg1: i32, %arg2: memref<2xi32, #tpu.memory_space<smem>>) -> (i32, i32, i32) {
    %c0_i32 = arith.constant 0 : i32
    %c0_i32_0 = arith.constant 0 : i32
    %c0_i32_1 = arith.constant 0 : i32
    return %arg0, %c0_i32, %c0_i32_0 : i32, i32, i32
  }
  func.func @transform_1(%arg0: i32, %arg1: i32, %arg2: memref<2xi32, #tpu.memory_space<smem>>) -> (i32, i32) {
    %c0_i32 = arith.constant 0 : i32
    %c0_i32_0 = arith.constant 0 : i32
    %c0_i32_1 = arith.constant 0 : i32
    return %c0_i32, %c0_i32_0 : i32, i32
  }
  func.func @transform_2(%arg0: i32, %arg1: i32, %arg2: memref<2xi32, #tpu.memory_space<smem>>) -> (i32, i32) {
    %c0_i32 = arith.constant 0 : i32
    %c0_i32_0 = arith.constant 0 : i32
    %c0_i32_1 = arith.constant 0 : i32
    return %c0_i32, %c0_i32_0 : i32, i32
  }
  func.func @transform_3(%arg0: i32, %arg1: i32, %arg2: memref<2xi32, #tpu.memory_space<smem>>) -> (i32, i32) {
    %c0_i32 = arith.constant 0 : i32
    %c0_i32_0 = arith.constant 0 : i32
    %c0_i32_1 = arith.constant 0 : i32
    return %c0_i32, %c0_i32_0 : i32, i32
  }
  func.func @transform_4(%arg0: i32, %arg1: i32, %arg2: memref<2xi32, #tpu.memory_space<smem>>) -> (i32, i32, i32, i32) {
    %c0_i32 = arith.constant 0 : i32
    %c0_i32_0 = arith.constant 0 : i32
    %c0_i32_1 = arith.constant 0 : i32
    %c0_i32_2 = arith.constant 0 : i32
    return %arg1, %c0_i32, %c0_i32_0, %c0_i32_1 : i32, i32, i32, i32
  }
  func.func @transform_5(%arg0: i32, %arg1: i32, %arg2: memref<2xi32, #tpu.memory_space<smem>>) -> (i32, i32, i32, i32) {
    %c0_i32 = arith.constant 0 : i32
    %c0_i32_0 = arith.constant 0 : i32
    %c0_i32_1 = arith.constant 0 : i32
    %c0_i32_2 = arith.constant 0 : i32
    return %arg1, %c0_i32, %c0_i32_0, %c0_i32_1 : i32, i32, i32, i32
  }
  func.func @transform_6(%arg0: i32, %arg1: i32, %arg2: memref<2xi32, #tpu.memory_space<smem>>) -> (i32, i32, i32, i32) {
    %c0_i32 = arith.constant 0 : i32
    %c0_i32_0 = arith.constant 0 : i32
    %c0_i32_1 = arith.constant 0 : i32
    %c0_i32_2 = arith.constant 0 : i32
    return %arg1, %c0_i32, %c0_i32_0, %c0_i32_1 : i32, i32, i32, i32
  }
  func.func @transform_7(%arg0: i32, %arg1: i32, %arg2: memref<2xi32, #tpu.memory_space<smem>>) -> (i32, i32, i32) {
    %c0_i32 = arith.constant 0 : i32
    %c0_i32_0 = arith.constant 0 : i32
    %c0_i32_1 = arith.constant 0 : i32
    return %arg1, %c0_i32, %c0_i32_0 : i32, i32, i32
  }
  func.func @transform_8(%arg0: i32, %arg1: i32, %arg2: memref<2xi32, #tpu.memory_space<smem>>) -> (i32, i32, i32) {
    %c0_i32 = arith.constant 0 : i32
    %c0_i32_0 = arith.constant 0 : i32
    %c0_i32_1 = arith.constant 0 : i32
    return %arg1, %c0_i32, %c0_i32_0 : i32, i32, i32
  }
  func.func @transform_9(%arg0: i32, %arg1: i32, %arg2: memref<2xi32, #tpu.memory_space<smem>>) -> (i32, i32, i32) {
    %c0_i32 = arith.constant 0 : i32
    %c0_i32_0 = arith.constant 0 : i32
    %c0_i32_1 = arith.constant 0 : i32
    return %arg1, %c0_i32, %c0_i32_0 : i32, i32, i32
  }
  func.func @transform_10(%arg0: i32, %arg1: i32, %arg2: memref<2xi32, #tpu.memory_space<smem>>) -> (i32, i32, i32) {
    %c0_i32 = arith.constant 0 : i32
    %c0_i32_0 = arith.constant 0 : i32
    %c0_i32_1 = arith.constant 0 : i32
    return %arg1, %c0_i32, %c0_i32_0 : i32, i32, i32
  }
  func.func @transform_11(%arg0: i32, %arg1: i32, %arg2: memref<2xi32, #tpu.memory_space<smem>>) -> (i32, i32, i32) {
    %c0_i32 = arith.constant 0 : i32
    %c0_i32_0 = arith.constant 0 : i32
    %c0_i32_1 = arith.constant 0 : i32
    return %arg1, %c0_i32, %c0_i32_0 : i32, i32, i32
  }
  func.func @transform_12(%arg0: i32, %arg1: i32, %arg2: memref<2xi32, #tpu.memory_space<smem>>) -> (i32, i32, i32) {
    %c0_i32 = arith.constant 0 : i32
    %c0_i32_0 = arith.constant 0 : i32
    %c0_i32_1 = arith.constant 0 : i32
    return %arg1, %c0_i32, %c0_i32_0 : i32, i32, i32
  }
  func.func @transform_13(%arg0: i32, %arg1: i32, %arg2: memref<2xi32, #tpu.memory_space<smem>>) -> (i32, i32, i32) {
    %c0_i32 = arith.constant 0 : i32
    %c0_i32_0 = arith.constant 0 : i32
    %c0_i32_1 = arith.constant 0 : i32
    return %arg1, %c0_i32, %c0_i32_0 : i32, i32, i32
  }
  func.func @transform_14(%arg0: i32, %arg1: i32, %arg2: memref<2xi32, #tpu.memory_space<smem>>) -> (i32, i32, i32) {
    %c0_i32 = arith.constant 0 : i32
    %c0_i32_0 = arith.constant 0 : i32
    %c0_i32_1 = arith.constant 0 : i32
    return %arg1, %c0_i32, %c0_i32_0 : i32, i32, i32
  }
  func.func @transform_15(%arg0: i32, %arg1: i32, %arg2: memref<2xi32, #tpu.memory_space<smem>>) -> (i32, i32, i32) {
    %c0_i32 = arith.constant 0 : i32
    %c0_i32_0 = arith.constant 0 : i32
    %c0_i32_1 = arith.constant 0 : i32
    return %arg1, %c0_i32, %c0_i32_0 : i32, i32, i32
  }
  func.func @transform_16(%arg0: i32, %arg1: i32, %arg2: memref<2xi32, #tpu.memory_space<smem>>) -> (i32, i32, i32) {
    %c0_i32 = arith.constant 0 : i32
    %c0_i32_0 = arith.constant 0 : i32
    %c0_i32_1 = arith.constant 0 : i32
    return %arg0, %c0_i32, %c0_i32_0 : i32, i32, i32
  }
}

</mosaic_0001>

<bundles_post_ra>
// kernel: tpu_custom_call.1
= control target key start
LH: loop header
LB: loop body
LE: loop exit
PB: predicated region body
PF: predicated region fallthrough
CT: control target
= control target key end

     0   :  { %s2160_s27 = smov [#allocation4]   ;;  %s2649_s0 = inlined_call_operand.vmem [shape: s32[2], index: 0, kind: input, shape index: {}]   ;;  %s2650_s1 = inlined_call_operand.vmem [shape: f32[2,8,16], index: 1, kind: input, shape index: {}]   ;;  %s2651_s2 = inlined_call_operand.vmem [shape: f32[8,32], index: 2, kind: input, shape index: {}]   ;;  %s2652_s3 = inlined_call_operand.vmem [shape: f32[16,32], index: 3, kind: input, shape index: {}]   ;;  %s2653_s4 = inlined_call_operand.vmem [shape: f32[1,32], index: 4, kind: input, shape index: {}]   ;;  %s2654_s5 = inlined_call_operand.vmem [shape: f32[2,12,32,8], index: 5, kind: input, shape index: {}]   ;;  %s2655_s6 = inlined_call_operand.vmem [shape: f32[2,12,1,8], index: 6, kind: input, shape index: {}]   ;;  %s2656_s7 = inlined_call_operand.vmem [shape: f32[2,4,8,32], index: 7, kind: input, shape index: {}]   ;;  %s2657_s8 = inlined_call_operand.vmem [shape: f32[2,1,32], index: 8, kind: input, shape index: {}]   ;;  %s2658_s9 = inlined_call_operand.vmem [shape: f32[2,32,64], index: 9, kind: input, shape index: {}]   ;;  %s2659_s10 = inlined_call_operand.vmem [shape: f32[2,1,64], index: 10, kind: input, shape index: {}]   ;;  %s2660_s11 = inlined_call_operand.vmem [shape: f32[2,64,32], index: 11, kind: input, shape index: {}]   ;;  %s2661_s12 = inlined_call_operand.vmem [shape: f32[2,1,32], index: 12, kind: input, shape index: {}]   ;;  %s2662_s13 = inlined_call_operand.vmem [shape: f32[2,1,32], index: 13, kind: input, shape index: {}]   ;;  %s2663_s14 = inlined_call_operand.vmem [shape: f32[2,1,32], index: 14, kind: input, shape index: {}]   ;;  %s2664_s15 = inlined_call_operand.vmem [shape: f32[2,1,32], index: 15, kind: input, shape index: {}]   ;;  %s2665_s16 = inlined_call_operand.vmem [shape: f32[2,1,32], index: 16, kind: input, shape index: {}]   ;;  %s2666_s17 = inlined_call_operand.hbm [shape: f32[2,8,32], index: 17, kind: output, shape index: {}]  }
   0x1   :  { %2683 = sst [smem:[#allocation22_spill]] %s2649_s0 }
   0x2   :  { %2684 = sst [smem:[#allocation23_spill]] %s2650_s1 }
   0x3   :  { %2685 = sst [smem:[#allocation24_spill]] %s2651_s2 }
   0x4   :  { %2686 = sst [smem:[#allocation25_spill]] %s2652_s3 }
   0x5   :  { %2687 = sst [smem:[#allocation26_spill]] %s2653_s4 }
   0x6   :  { %2688 = sst [smem:[#allocation27_spill]] %s2654_s5 }
   0x7   :  { %2689 = sst [smem:[#allocation28_spill]] %s2655_s6 }
   0x8   :  { %2690 = sst [smem:[#allocation29_spill]] %s2656_s7 }
   0x9   :  { %2691 = sst [smem:[#allocation30_spill]] %s2658_s9 }
   0xa   :  { %2692 = sst [smem:[#allocation31_spill]] %s2660_s11 }
   0xb   :  { %2693 = sst [smem:[#allocation32_spill]] %s2661_s12 }
   0xc   :  { %2694 = sst [smem:[#allocation33_spill]] %s2665_s16 }
   0xd   :  { %2695 = sst [smem:[#allocation34_spill]] %s2666_s17 }
   0xe   :  { %s2696_s26 = sld [smem:[#allocation22_spill]] }
  0x14   :  { %s23_s2 = sshll.u32 %s2696_s26, 4  ;;  %s24_s2 = int_to_ptr.vmem [resolvable:$true] %s23_s2 }
  0x15   :  { %26 = dma.vmem_to_smem %s24_s2, 16, %s2160_s27, [#allocation3] }
  0x16   :  { %2122 = dma.done.wait [#allocation3], 16 }
  0x17   :  { %2123 = vsyncadd [#allocation3], 4294967280 }
  0x18   :  { %29 = sfence }
  0x19   :  { %30 = vsyncpa [#allocation6], 0 }
  0x1a   :  { %32 = vsyncpa [#allocation6 + $0x1], 0  ;;  %s2255_s28 = smov 0   ;;  %s2257_s29 = smov 0  }
  0x1b   :  { %s2259_s0 = smov 0   ;;  %s2261_s30 = smov 0  }
  0x1c   :  { %s2263_s18 = smov 0   ;;  %s2265_s19 = smov 0  }
  0x1d   :  { %s2267_s1 = smov 0   ;;  %s2269_s2 = smov 0  }
  0x1e LB: > { %2697 = sst [smem:[#allocation9_spill]] %s2130_s28  ;;  %s1879_s20 = sadd.s32 4294967295, %s2158_s2   ;;  %s2158_s2 = sphi %s2269_s2, %s38_s2   ;;  %s2154_s1 = sphi %s2267_s1, %s2749_s1   ;;  %s2150_s19 = sphi %s2265_s19, %s2748_s19   ;;  %s2146_s18 = sphi %s2263_s18, %s2747_s18   ;;  %s2142_s30 = sphi %s2261_s30, %s2746_s30   ;;  %s2138_s0 = sphi %s2259_s0, %s2745_s0   ;;  %s2134_s29 = sphi %s2257_s29, %s2744_s29   ;;  %s2130_s28 = sphi %s2255_s28, %s2743_s28  }
  0x1f   : > { %2698 = sst [smem:[#allocation10_spill]] %s2134_s29  ;;  %s1880_s21 = sadd.s32 4294967294, %s2158_s2  }
  0x20   : > { %2699 = sst [smem:[#allocation11_spill]] %s2138_s0  ;;  %s47_s22 = sadd.s32 1, %s2150_s19 }
  0x21   : > { %2700 = sst [smem:[#allocation12_spill]] %s2142_s30  ;;  %p48_p0 = scmp.ge.s32.totalorder %s47_s22, 2 }
  0x22   : > { %2701 = sst [smem:[#allocation13_spill]] %s2146_s18  ;;  %s50_s23 = sadd.s32 1, %s2154_s1 }
  0x23   : > { %2702 = sst [smem:[#allocation14_spill]] %s2150_s19  ;;  %p468_p1 = scmp.ne.s32.totalorder %s2138_s0, %s2134_s29 }
  0x24   : > { %2703 = sst [smem:[#allocation15_spill]] %s2154_s1  ;;  %p469_p2 = scmp.eq.s32.totalorder %s1879_s20, 3 }
  0x25   : > { %2704 = sst [smem:[#allocation16_spill]] %s2158_s2  ;;  %s2751_s22 = smov (%p48_p0, %s47_s22), 0 }
  0x26   : > { %2705 = sst [smem:[#allocation17_spill]] %s2751_s22  ;;  %s2753_s23 = smov (!%p48_p0, %s50_s23), %s2154_s1 }
  0x27   : > { %p2304_p3 = por %p469_p2, %p468_p1  ;;  %p474_p4 = scmp.ne.s32.totalorder %s2134_s29, %s2130_s28 }
  0x28   : > { %p52_p5 = scmp.ge.s32.totalorder %s2753_s23, 2  ;;  %p475_p6 = scmp.eq.s32.totalorder %s1880_s21, 3 }
  0x29   : > { %s2706_s24 = scalar_select %p2304_p3, 1, 0 }
  0x2a   : > { %p1883_p7 = scmp.ge.s32.totalorder %s2158_s2, 1  ;;  %p590_p8 = scmp.lt.s32.totalorder %s2158_s2, 5 }
  0x2b   : > { %2707 = sst [smem:[#allocation18_spill]] %s2706_s24  ;;  %s2755_s23 = smov (%p52_p5, %s2753_s23), 0 }
  0x2c   : > { %2708 = sst [smem:[#allocation19_spill]] %s2755_s23  ;;  %p2314_p9 = por %p475_p6, %p474_p4 }
  0x2d   : > { %p591_p10 = pnand %p1883_p7, %p590_p8  ;;  %s455_s26 = ssub.s32 %s2154_s1, %s2755_s23 }
  0x2e   : > { %s2709_s25 = scalar_select %p2314_p9, 1, 0 }
  0x2f   : > { %s458_s27 = sadd.s32 1, %s2138_s0  ;;  %p456_p11 = scmp.eq.s32.totalorder %s455_s26, 0 }
  0x30   : > { %2710 = sst [smem:[#allocation20_spill]] %s2709_s25  ;;  %594 = sbr.rel (%p591_p10) target bundleno = 3328 (0xd00), region = 84 }
  0x31   : > { %s2322_s20 = scalar_select %p456_p11, %s2138_s0, %s458_s27  }
  0x32   : > { %s2671_s21 = sand.u32 (!%p591_p10), 1, %s2134_s29   ;;  %p684_p12 = scmp.lt.s32.totalorder (!%p591_p10), %s2146_s18, 1 }
  0x33   : > { %2711 = sst [smem:[#allocation21_spill]] %s2322_s20  ;;  %s2328_s22 = sshll.u32 (!%p591_p10), %s2671_s21, 3 }
  0x34   : > { %p688_p13 = scmp.lt.s32.totalorder (!%p591_p10), %s2142_s30, 1  ;;  %s2712_s1 = sld [smem:[#allocation23_spill]] (!%p591_p10) }
  0x35   : > { %s685_s19 = scalar_select %p684_p12, %s2146_s18, 1 }
  0x36   : > { %s2333_s25 = scalar_select %p688_p13, %s2142_s30, 1 }
  0x37   : > { %s1885_s26 = sshll.u32 %s685_s19, 3  ;;  %s2713_s5 = sld [smem:[#allocation27_spill]] }
  0x38   : > { %s1933_s20 = smul.u32 384, %s2333_s25  ;;  %s1930_s28 = sshll.u32 %s2333_s25, 5 }
  0x39   : > { %s1934_s0 = smul.u32 12, %s2333_s25  ;;  %s2714_s7 = sld [smem:[#allocation29_spill]] }
  0x3a   : > { %s687_s21 = scalar_lea.vmem %s2712_s1, %s1885_s26  ;;  %s2715_s6 = sld [smem:[#allocation28_spill]] }
  0x3b   : > { %s2716_s9 = sld [smem:[#allocation30_spill]]  ;;  %s1932_s18 = sshll.u32 %s2333_s25, 6 }
  0x3c   : > { %s2718_s11 = sld [smem:[#allocation31_spill]]  ;;  %s726_s27 = scalar_lea.vmem %s2663_s14, %s2333_s25 }
  0x3d   : > { %s2344_s24 = scalar_lea.vmem %s2713_s5, %s1933_s20  ;;  %s729_s29 = scalar_lea.vmem %s2664_s15, %s2333_s25 }
  0x3e   : > { %s683_s12 = scalar_lea.vmem [#allocation5], %s2328_s22 }
  0x3f   : > { %s2349_s4 = scalar_lea.vmem %s2714_s7, %s1930_s28  ;;  %s2719_s7 = sld [smem:[#allocation33_spill]] }
  0x40   : > { %s2354_s23 = scalar_lea.vmem %s2715_s6, %s1934_s0  ;;  %s2720_s0 = sld [smem:[#allocation12_spill]] }
  0x41   : > { %s2363_s17 = scalar_lea.vmem %s2716_s9, %s1930_s28 }
  0x42   : > { %s2377_s6 = scalar_lea.vmem %s2718_s11, %s1932_s18 }
  0x45   : > { %s732_s3 = scalar_lea.vmem %s2719_s7, %s2333_s25 }
  0x46   : > { %p1893_p0 = scmp.ne.s32.totalorder %s2720_s0, 0 }
  0x47   : > { %s2721_s1 = sld [smem:[#allocation25_spill]] (!%p1893_p0) }
  0x48   : > { %736 = sbr.rel (%p1893_p0) target bundleno = 214 (0xd6), region = 88  ;;  %s2723_s30 = sld [smem:[#allocation26_spill]] (!%p1893_p0) }
  0x49   : > { %s2724_s5 = sld [smem:[#allocation24_spill]] (!%p1893_p0) }
  0x4d   : > { %s2722_s26 = smov %s2721_s1  ;;  %v739_v0 = vld [vmem:[%s2721_s1 + $0x8] sm:$0xff]  ;;  %v737_v2 = vld [vmem:[%s687_s21] sm:$0xff]  ;;  %vm744_vm0 = vcmask 130048   ;;  %vm771_vm1 = vcmask 261120  }
  0x4e   : > { %v738_v1 = vld [vmem:[%s2722_s26] sm:$0xff]  ;;  %762 = vmatpush.msra.mxu0 %v739_v0 }
  0x4f   : > { %v2008_v3 = vld [vmem:[%s2723_s30] ss:$0 sm:$0xff] }
  0x50   : > { %763 = vmatpush.msra.mxu0 %v738_v1  ;;  %v769_v6 = vld [vmem:[%s2724_s5] sm:$0xff] }
  0x51   : > { %1894 = vmatmul.msk.f32.vlgmr.msra.gmra.mxu0 %vm744_vm0, %v737_v2 }
  0xce   : > { %v765_v4 = vpop.f32.mrf.mxu0 }
  0xcf   : > { %v766_v5 = vadd.f32 %v2008_v3, %v765_v4 }
  0xd1   : > { %v768_v7 = vmul.f32 5.656854, %v766_v5 }
  0xd3   : > { %v770_v8 = vadd.f32 %v769_v6, %v768_v7 }
  0xd5   : > { %772 = vst.msk [vmem:[#allocation2] sm:$0xff] %vm771_vm1, %v770_v8 }
  0xd6 PF: > { %v782_v9 = vld [vmem:[%s2344_s24 + $0x18] sm:$0xff]  ;;  %v781_v10 = vld [vmem:[%s2344_s24 + $0x10] sm:$0xff]  ;;  %v780_v11 = vld [vmem:[%s2344_s24 + $0x8] sm:$0xff]  ;;  %vm847_vm2 = vcmask 261120   ;;  %s2725_s11 = sld [smem:[#allocation13_spill]]  ;;  %vm917_vm3 = vcmask 64512   ;;  %v774_v24 = vlaneseq  ;;  %s2729_s7 = scalar_lea.vmem %s2662_s13, %s2333_s25 }
  0xd7   : > { %863 = vmatpush.msra.mxu1 %v782_v9  ;;  %v779_v12 = vld [vmem:[%s2344_s24] sm:$0xff]  ;;  %v798_v14 = vld [vmem:[%s2344_s24 + $0x98] sm:$0xff]  ;;  %v797_v15 = vld [vmem:[%s2344_s24 + $0x90] sm:$0xff]  ;;  %s2730_s28 = scalar_lea.vmem %s2659_s10, %s2333_s25  ;;  %s2731_s30 = sld [smem:[#allocation32_spill]] }
  0xd8   : > { %v796_v16 = vld [vmem:[%s2344_s24 + $0x88] sm:$0xff]  ;;  %v795_v17 = vld [vmem:[%s2344_s24 + $0x80] sm:$0xff]  ;;  %v775_v25 = vand.u32 127, %v774_v24  ;;  %v814_v32 = vld [vmem:[%s2344_s24 + $0x118] sm:$0xff] }
  0xd9   : > { %864 = vmatpush.msra.mxu1 %v781_v10  ;;  %v2010_v19 = vld [vmem:[%s2354_s23 + $0x4] ss:$0 sm:$0xff]  ;;  %v2009_v20 = vld [vmem:[%s2354_s23] ss:$0 sm:$0xff]  ;;  %v813_v33 = vld [vmem:[%s2344_s24 + $0x110] sm:$0xff]  ;;  %909 = vmatpush.msra.mxu2 %v814_v32 }
  0xda   : > { %v812_v34 = vld [vmem:[%s2344_s24 + $0x108] sm:$0xff]  ;;  %v811_v35 = vld [vmem:[%s2344_s24 + $0x100] sm:$0xff]  ;;  %v802_v36 = vld [vmem:[%s2344_s24 + $0xb8] sm:$0xff] }
  0xdb   : > { %865 = vmatpush.msra.mxu1 %v780_v11  ;;  %910 = vmatpush.msra.mxu2 %v813_v33  ;;  %v801_v37 = vld [vmem:[%s2344_s24 + $0xb0] sm:$0xff]  ;;  %v786_v38 = vld [vmem:[%s2344_s24 + $0x38] sm:$0xff]  ;;  %v800_v40 = vld [vmem:[%s2344_s24 + $0xa8] sm:$0xff] }
  0xdc   : > { %v2413_v13 = vld [vmem:[#allocation2] sm:$0xff]  ;;  %s776_s21 = sld [smem:[#allocation4 + %s2725_s11]]  ;;  %1008 = vmatpush.msra.mxu0 %v786_v38  ;;  %v785_v39 = vld [vmem:[%s2344_s24 + $0x30] sm:$0xff]  ;;  %v784_v41 = vld [vmem:[%s2344_s24 + $0x28] sm:$0xff] }
  0xdd   : > { %866 = vmatpush.msra.mxu1 %v779_v12  ;;  %911 = vmatpush.msra.mxu2 %v812_v34  ;;  %v799_v42 = vld [vmem:[%s2344_s24 + $0xa0] sm:$0xff]  ;;  %v2011_v49 = vld [vmem:[%s2354_s23 + $0x8] ss:$0 sm:$0xff]  ;;  %v818_v55 = vld [vmem:[%s2344_s24 + $0x138] sm:$0xff]  ;;  %s2732_s2 = scalar_lea.vmem %s2731_s30, %s2333_s25 }
  0xde   : > { %1895 = vmatmul.msk.f32.vlgmr.msra.gmra.mxu1 %vm847_vm2, %v2413_v13  ;;  %1009 = vmatpush.msra.mxu0 %v785_v39  ;;  %v783_v43 = vld [vmem:[%s2344_s24 + $0x20] sm:$0xff]  ;;  %v817_v56 = vld [vmem:[%s2344_s24 + $0x130] sm:$0xff]  ;;  %v816_v57 = vld [vmem:[%s2344_s24 + $0x128] sm:$0xff] }
  0xdf   : > { %886 = vmatpush.msrb.mxu1 %v798_v14  ;;  %912 = vmatpush.msra.mxu2 %v811_v35  ;;  %v2012_v52 = vld [vmem:[%s2354_s23 + $0x5] ss:$0 sm:$0xff]  ;;  %v2013_v7 = vld [vmem:[%s2354_s23 + $0x1] ss:$0 sm:$0xff]  ;;  %v2014_v11 = vld [vmem:[%s2354_s23 + $0x9] ss:$0 sm:$0xff] }
  0xe0   : > { %1897 = vmatmul.msk.f32.vlgmr.msra.gmra.mxu2 %vm847_vm2, %v2413_v13  ;;  %1010 = vmatpush.msra.mxu0 %v784_v41  ;;  %v815_v59 = vld [vmem:[%s2344_s24 + $0x120] sm:$0xff]  ;;  %v804_v32 = vld [vmem:[%s2344_s24 + $0xc8] sm:$0xff] }
  0xe1   : > { %887 = vmatpush.msrb.mxu1 %v797_v15  ;;  %1054 = vmatpush.msrb.mxu2 %v818_v55  ;;  %v839_v10 = vld [vmem:[%s2349_s4] sm:$0xff] }
  0xe2   : > { %v777_v26 = vstv %s776_s21  ;;  %1011 = vmatpush.msra.mxu0 %v783_v43  ;;  %v803_v33 = vld [vmem:[%s2344_s24 + $0xc0] sm:$0xff] }
  0xe3   : > { %888 = vmatpush.msrb.mxu1 %v796_v16  ;;  %vm2428_vm4 = vcmp.lt.s32.totalorder %v775_v25, %v777_v26  ;;  %1901 = vmatmul.msk.f32.vlgmr.msra.gmra.mxu0 %vm847_vm2, %v2413_v13  ;;  %v790_v25 = vld [vmem:[%s2344_s24 + $0x58] sm:$0xff]  ;;  %v789_v26 = vld [vmem:[%s2344_s24 + $0x50] sm:$0xff] }
  0xe4   : > { %1055 = vmatpush.msrb.mxu2 %v817_v56 }
  0xe5   : > { %889 = vmatpush.msrb.mxu1 %v795_v17 }
  0xe6   : > { %1896 = vmatmul.msk.f32.vlgmr.msrb.gmra.mxu1 %vm847_vm2, %v2413_v13  ;;  %1056 = vmatpush.msrb.mxu2 %v816_v57 }
  0xe7   : > { %1031 = vmatpush.msra.mxu1 %v802_v36 }
  0xe8   : > { %1057 = vmatpush.msrb.mxu2 %v815_v59  ;;  %v822_v59 = vld [vmem:[%s2344_s24 + $0x158] sm:$0xff] }
  0xe9   : > { %1032 = vmatpush.msra.mxu1 %v801_v37  ;;  %1903 = vmatmul.msk.f32.vlgmr.msrb.gmra.mxu2 %vm847_vm2, %v2413_v13 }
  0xea   : > { %1178 = vmatpush.msra.mxu2 %v839_v10  ;;  %v808_v10 = vld [vmem:[%s2344_s24 + $0xe8] sm:$0xff] }
  0xeb   : > { %1033 = vmatpush.msra.mxu1 %v800_v40 }
  0xed   : > { %1034 = vmatpush.msra.mxu1 %v799_v42 }
  0xee   : > { %1902 = vmatmul.msk.f32.vlgmr.msra.gmra.mxu1 %vm847_vm2, %v2413_v13 }
 0x15b   : > { %v868_v18 = vpop.f32.mrf.mxu1 }
 0x15c   : > { %v869_v23 = vadd.f32 %v2009_v20, %v868_v18 }
 0x160   : > { %v1013_v8 = vpop.f32.mrf.mxu0 }
 0x161   : > { %v1014_v9 = vadd.f32 %v2013_v7, %v1013_v8 }
 0x163   : > { %v891_v21 = vpop.f32.mrf.mxu1  ;;  %v914_v50 = vpop.f32.mrf.mxu2 }
 0x164   : > { %v892_v22 = vadd.f32 %v2010_v19, %v891_v21  ;;  %v915_v51 = vadd.f32 %v2011_v49, %v914_v50  ;;  %v2016_v49 = vld [vmem:[%s2354_s23 + $0x2] ss:$0 sm:$0xff] }
 0x166   : > { %1898 = vmatpush.xpose.msk.msra.mxu3 %vm917_vm3, %v892_v22 }
 0x169   : > { %1899 = vmatmul.msk.f32.vlgmr.msra.gmra.mxu3 %vm917_vm3, %v869_v23 }
 0x16a   : > { %988 = vmatpush.msrb.mxu3 %v915_v51 }
 0x16b   : > { %v1036_v53 = vpop.f32.mrf.mxu1 }
 0x16c   : > { %v1037_v54 = vadd.f32 %v2012_v52, %v1036_v53  ;;  %v1059_v12 = vpop.f32.mrf.mxu2 }
 0x16d   : > { %v1060_v14 = vadd.f32 %v2014_v11, %v1059_v12  ;;  %v807_v11 = vld [vmem:[%s2344_s24 + $0xe0] sm:$0xff]  ;;  %v794_v12 = vld [vmem:[%s2344_s24 + $0x78] sm:$0xff] }
 0x16e   : > { %1904 = vmatpush.xpose.msk.msra.mxu3 %vm917_vm3, %v1037_v54 }
 0x16f   : > { %1132 = vmatpush.msrb.mxu0 %v1060_v14  ;;  %v793_v14 = vld [vmem:[%s2344_s24 + $0x70] sm:$0xff] }
 0x1ec   : > { %v941_v27 = vpop.f32.mrf.mxu3 }
 0x1ed   : > { %v944_v29 = vmul.f32 0.35355338, %v941_v27  ;;  %v806_v27 = vld [vmem:[%s2344_s24 + $0xd8] sm:$0xff] }
 0x1ee   : > { %1221 = vmatpush.msra.mxu0 %v806_v27 }
 0x1ef   : > { %v945_v30 = vsel %vm2428_vm4, %v944_v29, -1000000.0  ;;  %v788_v29 = vld [vmem:[%s2344_s24 + $0x48] sm:$0xff] }
 0x1f0   : > { %v946_v31 = vsel %vm917_vm3, %v945_v30, -inf }
 0x1f1   : > { %947 = vmax.xlane.f32.xlu0 %v946_v31  ;;  %v787_v31 = vld [vmem:[%s2344_s24 + $0x40] sm:$0xff] }
 0x264   : > { %v948_v44 = vpop.xlane.xlu0 %947 }
 0x265   : > { %v949_v45 = vsub.f32 %v945_v30, %v948_v44  ;;  %v805_v30 = vld [vmem:[%s2344_s24 + $0xd0] sm:$0xff] }
 0x266   : > { %1222 = vmatpush.msra.mxu0 %v805_v30 }
 0x267   : > { %v950_v46 = vmul.f32 1.442695, %v949_v45 }
 0x268   : > { %1223 = vmatpush.msra.mxu0 %v804_v32 }
 0x269   : > { %2028 = vpow2.f32 %v950_v46  ;;  %v840_v46 = vld [vmem:[%s2349_s4 + $0x8] sm:$0xff] }
 0x26a   : > { %1224 = vmatpush.msra.mxu0 %v803_v33  ;;  %1155 = vmatpush.msrb.mxu1 %v840_v46  ;;  %v825_v46 = vld [vmem:[%s2344_s24 + $0x170] sm:$0xff] }
 0x26c   : > { %1244 = vmatpush.msra.mxu1 %v822_v59 }
 0x26f   : > { %v2029_v47 = vpop.eup %2028 }
 0x270   : > { %v952_v48 = vsel %vm917_vm3, %v2029_v47, 0.0 }
 0x271   : > { %953 = vadd.xlane.f32.xlu0 %v952_v48  ;;  %v2015_v48 = vld [vmem:[%s2354_s23 + $0x6] ss:$0 sm:$0xff] }
 0x2e4   : > { %v954_v58 = vpop.xlane.xlu0 %953 }
 0x2e5   : > { %2030 = vrcp.f32 %v954_v58  ;;  %v966_v63 = vand.u32 2147483648, %v954_v58  ;;  %v964_v1 = vand.u32 2147483647, %v954_v58  ;;  %vm960_vm6 = vweird.f32 %v954_v58 }
 0x2e7   : > { %v967_v3 = vor.u32 1.1754944e-38, %v966_v63  ;;  %vm965_vm8 = vcmp.eq.f32.partialorder %v964_v1, 8.507059e+37 }
 0x2eb   : > { %v2031_v60 = vpop.eup %2030 }
 0x2ec   : > { %v956_v61 = vmul.f32 %v2031_v60, %v954_v58  ;;  %vm961_vm5 = vweird.f32 %v2031_v60 }
 0x2ed   : > { %vm962_vm7 = vmor %vm960_vm6, %vm961_vm5 }
 0x2ee   : > { %v957_v62 = vsub.f32 1.0, %v956_v61  ;;  %v820_v61 = vld [vmem:[%s2344_s24 + $0x148] sm:$0xff] }
 0x2f0   : > { %v958_v0 = vmul.f32 %v2031_v60, %v957_v62  ;;  %v819_v62 = vld [vmem:[%s2344_s24 + $0x140] sm:$0xff] }
 0x2f2   : > { %v959_v2 = vadd.f32 %v2031_v60, %v958_v0 }
 0x2f4   : > { %v963_v4 = vsel %vm962_vm7, %v2031_v60, %v959_v2  ;;  %v821_v60 = vld [vmem:[%s2344_s24 + $0x150] sm:$0xff] }
 0x2f5   : > { %v968_v5 = vsel %vm965_vm8, %v967_v3, %v963_v4  ;;  %1245 = vmatpush.msra.mxu1 %v821_v60 }
 0x2f6   : > { %v969_v6 = vmul.f32 %v2029_v47, %v968_v5  ;;  %v2017_v5 = vld [vmem:[%s2354_s23 + $0xa] ss:$0 sm:$0xff] }
 0x2f7   : > { %1246 = vmatpush.msra.mxu1 %v820_v61 }
 0x2f8   : > { %1900 = vmatmul.msk.f32.vlgmr.msrb.gmra.mxu3 %vm917_vm3, %v969_v6  ;;  %v810_v6 = vld [vmem:[%s2344_s24 + $0xf8] sm:$0xff] }
 0x2f9   : > { %1198 = vmatpush.msrb.mxu3 %v790_v25  ;;  %1247 = vmatpush.msra.mxu1 %v819_v62 }
 0x2fb   : > { %1199 = vmatpush.msrb.mxu3 %v789_v26 }
 0x2fd   : > { %1200 = vmatpush.msrb.mxu3 %v788_v29 }
 0x2ff   : > { %1201 = vmatpush.msrb.mxu3 %v787_v31  ;;  %v2018_v31 = vld [vmem:[%s2354_s23 + $0x7] ss:$0 sm:$0xff] }
 0x300   : > { %1905 = vmatmul.msk.f32.vlgmr.msra.gmra.mxu3 %vm917_vm3, %v1014_v9  ;;  %v809_v9 = vld [vmem:[%s2344_s24 + $0xf0] sm:$0xff] }
 0x308   : > { %1909 = vmatmul.msk.f32.vlgmr.msrb.gmra.mxu3 %vm847_vm2, %v2413_v13 }
 0x37b   : > { %v990_v15 = vpop.f32.mrf.mxu3 }
 0x37c   : > { %1908 = vmatmul.msk.f32.vlgmr.msra.gmra.mxu2 %vm917_vm3, %v990_v15  ;;  %v841_v15 = vld [vmem:[%s2349_s4 + $0x10] sm:$0xff] }
 0x383   : > { %v1085_v16 = vpop.f32.mrf.mxu3 }
 0x384   : > { %v1088_v17 = vmul.f32 0.35355338, %v1085_v16  ;;  %v792_v16 = vld [vmem:[%s2344_s24 + $0x68] sm:$0xff] }
 0x386   : > { %v1089_v18 = vsel %vm2428_vm4, %v1088_v17, -1000000.0  ;;  %v791_v17 = vld [vmem:[%s2344_s24 + $0x60] sm:$0xff] }
 0x387   : > { %v1090_v19 = vsel %vm917_vm3, %v1089_v18, -inf }
 0x388   : > { %1091 = vmax.xlane.f32.xlu1 %v1090_v19 }
 0x38b   : > { %v1203_v50 = vpop.f32.mrf.mxu3 }
 0x38c   : > { %v1204_v53 = vadd.f32 %v2016_v49, %v1203_v50 }
 0x3fb   : > { %v1092_v20 = vpop.xlane.xlu1 %1091 }
 0x3fc   : > { %v1093_v21 = vsub.f32 %v1089_v18, %v1092_v20 }
 0x3fe   : > { %v1094_v22 = vmul.f32 1.442695, %v1093_v21 }
 0x3ff   : > { %v2492_v54 = vpop.f32.mrf.mxu2 }
 0x400   : > { %2032 = vpow2.f32 %v1094_v22 }
 0x406   : > { %v2033_v23 = vpop.eup %2032 }
 0x407   : > { %v1096_v24 = vsel %vm917_vm3, %v2033_v23, 0.0 }
 0x408   : > { %1097 = vadd.xlane.f32.xlu1 %v1096_v24 }
 0x47b   : > { %v1098_v34 = vpop.xlane.xlu1 %1097 }
 0x47c   : > { %2034 = vrcp.f32 %v1098_v34  ;;  %v1110_v38 = vand.u32 2147483648, %v1098_v34  ;;  %v1108_v40 = vand.u32 2147483647, %v1098_v34  ;;  %vm1104_vm10 = vweird.f32 %v1098_v34 }
 0x47e   : > { %v1111_v42 = vor.u32 1.1754944e-38, %v1110_v38  ;;  %vm1109_vm12 = vcmp.eq.f32.partialorder %v1108_v40, 8.507059e+37 }
 0x482   : > { %v2035_v35 = vpop.eup %2034 }
 0x483   : > { %v1100_v36 = vmul.f32 %v2035_v35, %v1098_v34  ;;  %vm1105_vm9 = vweird.f32 %v2035_v35 }
 0x484   : > { %vm1106_vm11 = vmor %vm1104_vm10, %vm1105_vm9  ;;  %vm1607_vm10 = vcmask 523264  }
 0x485   : > { %v1101_v37 = vsub.f32 1.0, %v1100_v36 }
 0x487   : > { %v1102_v39 = vmul.f32 %v2035_v35, %v1101_v37 }
 0x489   : > { %v1103_v41 = vadd.f32 %v2035_v35, %v1102_v39 }
 0x48b   : > { %v1107_v43 = vsel %vm1106_vm11, %v2035_v35, %v1103_v41  ;;  %v2019_v35 = vld [vmem:[%s2354_s23 + $0x3] ss:$0 sm:$0xff] }
 0x48c   : > { %v1112_v44 = vsel %vm1109_vm12, %v1111_v42, %v1107_v43 }
 0x48d   : > { %v1113_v45 = vmul.f32 %v2033_v23, %v1112_v44 }
 0x48f   : > { %1906 = vmatmul.msk.f32.vlgmr.msrb.gmra.mxu0 %vm917_vm3, %v1113_v45  ;;  %v826_v45 = vld [vmem:[%s2344_s24 + $0x178] sm:$0xff] }
 0x490   : > { %1345 = vmatpush.msrb.mxu0 %v841_v15 }
 0x497   : > { %1910 = vmatmul.msk.f32.vlgmr.msra.gmra.mxu0 %vm847_vm2, %v2413_v13 }
 0x50c   : > { %v1134_v47 = vpop.f32.mrf.mxu0 }
 0x50d   : > { %1907 = vmatmul.msk.f32.vlgmr.msrb.gmra.mxu1 %vm917_vm3, %v1134_v47  ;;  %v824_v47 = vld [vmem:[%s2344_s24 + $0x168] sm:$0xff] }
 0x50e   : > { %1366 = vmatpush.msrb.mxu1 %v794_v12  ;;  %v2161_v12 = vmov 32.0  }
 0x510   : > { %1367 = vmatpush.msrb.mxu1 %v793_v14 }
 0x512   : > { %1368 = vmatpush.msrb.mxu1 %v792_v16 }
 0x514   : > { %v1226_v51 = vpop.f32.mrf.mxu0  ;;  %1369 = vmatpush.msrb.mxu1 %v791_v17 }
 0x515   : > { %v1227_v52 = vadd.f32 %v2015_v48, %v1226_v51  ;;  %1911 = vmatmul.msk.f32.vlgmr.msra.gmra.mxu1 %vm847_vm2, %v2413_v13  ;;  %v823_v48 = vld [vmem:[%s2344_s24 + $0x160] sm:$0xff] }
 0x517   : > { %1912 = vmatpush.xpose.msk.msrb.mxu2 %vm917_vm3, %v1227_v52 }
 0x51a   : > { %1913 = vmatmul.msk.f32.vlgmr.msrb.gmra.mxu2 %vm917_vm3, %v1204_v53  ;;  %v2020_v53 = vld [vmem:[%s2354_s23 + $0xb] ss:$0 sm:$0xff]  ;;  %s2728_s23 = scalar_lea.vmem %s2657_s8, %s2333_s25 }
 0x51b   : > { %1389 = vmatpush.msra.mxu2 %v810_v6  ;;  %v2021_v6 = vld [vmem:[%s2728_s23] ss:$0 sm:$0xff] }
 0x51d   : > { %1390 = vmatpush.msra.mxu2 %v809_v9  ;;  %1916 = vmatmul.msk.f32.vlgmr.msrb.gmra.mxu1 %vm847_vm2, %v2413_v13 }
 0x51f   : > { %1391 = vmatpush.msra.mxu2 %v808_v10 }
 0x521   : > { %1392 = vmatpush.msra.mxu2 %v807_v11 }
 0x522   : > { %1917 = vmatmul.msk.f32.vlgmr.msra.gmra.mxu2 %vm847_vm2, %v2413_v13 }
 0x58a   : > { %v1157_v4 = vpop.f32.mrf.mxu1 }
 0x58b   : > { %v1181_v38 = vadd.f32 %v2492_v54, %v1157_v4 }
 0x592   : > { %v1249_v7 = vpop.f32.mrf.mxu1 }
 0x593   : > { %v1250_v8 = vadd.f32 %v2017_v5, %v1249_v7 }
 0x595   : > { %1322 = vmatpush.msra.mxu3 %v1250_v8 }
 0x597   : > { %1412 = vmatpush.msrb.mxu3 %v826_v45 }
 0x599   : > { %1413 = vmatpush.msrb.mxu3 %v825_v46  ;;  %v2023_v46 = vld [vmem:[%s726_s27] ss:$0 sm:$0xff] }
 0x59a   : > { %v1371_v36 = vpop.f32.mrf.mxu1 }
 0x59b   : > { %v1372_v37 = vadd.f32 %v2019_v35, %v1371_v36  ;;  %1414 = vmatpush.msrb.mxu3 %v824_v47  ;;  %v1598_v36 = vld [vmem:[%s2377_s6 + $0x18] sm:$0xff] }
 0x59d   : > { %v1275_v55 = vpop.f32.mrf.mxu2  ;;  %1415 = vmatpush.msrb.mxu3 %v823_v48 }
 0x59e   : > { %v1278_v56 = vmul.f32 0.35355338, %v1275_v55 }
 0x5a0   : > { %v1279_v57 = vsel %vm2428_vm4, %v1278_v56, -1000000.0  ;;  %v842_v56 = vld [vmem:[%s2349_s4 + $0x18] sm:$0xff]  ;;  %s2734_s4 = sld [smem:[#allocation12_spill]] }
 0x5a1   : > { %v1280_v58 = vsel %vm917_vm3, %v1279_v57, -inf  ;;  %1513 = vmatpush.msrb.mxu2 %v842_v56 }
 0x5a2   : > { %1281 = vmax.xlane.f32.xlu2 %v1280_v58 }
 0x5a5   : > { %v1394_v32 = vpop.f32.mrf.mxu2 }
 0x5a6   : > { %v1395_v33 = vadd.f32 %v2018_v31, %v1394_v32  ;;  %v1600_v31 = vld [vmem:[%s2377_s6 + $0x28] sm:$0xff]  ;;  %p1925_p1 = scmp.ne.s32.totalorder %s2734_s4, 1 }
 0x5a8   : > { %1919 = vmatpush.xpose.msk.msra.mxu0 %vm917_vm3, %v1395_v33 }
 0x615   : > { %v1282_v63 = vpop.xlane.xlu2 %1281 }
 0x616   : > { %v1283_v0 = vsub.f32 %v1279_v57, %v1282_v63 }
 0x618   : > { %v1284_v1 = vmul.f32 1.442695, %v1283_v0 }
 0x61a   : > { %2036 = vpow2.f32 %v1284_v1 }
 0x620   : > { %v2037_v2 = vpop.eup %2036 }
 0x621   : > { %v1286_v3 = vsel %vm917_vm3, %v2037_v2, 0.0 }
 0x622   : > { %1287 = vadd.xlane.f32.xlu2 %v1286_v3 }
 0x695   : > { %v1288_v18 = vpop.xlane.xlu2 %1287 }
 0x696   : > { %2038 = vrcp.f32 %v1288_v18  ;;  %v1300_v22 = vand.u32 2147483648, %v1288_v18  ;;  %v1298_v24 = vand.u32 2147483647, %v1288_v18  ;;  %vm1294_vm14 = vweird.f32 %v1288_v18 }
 0x698   : > { %v1301_v26 = vor.u32 1.1754944e-38, %v1300_v22  ;;  %vm1299_vm0 = vcmp.eq.f32.partialorder %v1298_v24, 8.507059e+37  ;;  %v1566_v24 = vld [vmem:[%s2363_s17 + $0x18] sm:$0xff] }
 0x69c   : > { %v2039_v19 = vpop.eup %2038 }
 0x69d   : > { %v1290_v20 = vmul.f32 %v2039_v19, %v1288_v18  ;;  %vm1295_vm13 = vweird.f32 %v2039_v19 }
 0x69e   : > { %vm1296_vm15 = vmor %vm1294_vm14, %vm1295_vm13 }
 0x69f   : > { %v1291_v21 = vsub.f32 1.0, %v1290_v20 }
 0x6a1   : > { %v1292_v23 = vmul.f32 %v2039_v19, %v1291_v21 }
 0x6a3   : > { %v1293_v25 = vadd.f32 %v2039_v19, %v1292_v23 }
 0x6a5   : > { %v1297_v27 = vsel %vm1296_vm15, %v2039_v19, %v1293_v25  ;;  %v1565_v25 = vld [vmem:[%s2363_s17 + $0x10] sm:$0xff] }
 0x6a6   : > { %v1302_v29 = vsel %vm1299_vm0, %v1301_v26, %v1297_v27  ;;  %v1564_v26 = vld [vmem:[%s2363_s17 + $0x8] sm:$0xff]  ;;  %v1563_v27 = vld [vmem:[%s2363_s17] sm:$0xff] }
 0x6a7   : > { %v1303_v30 = vmul.f32 %v2037_v2, %v1302_v29  ;;  %v1602_v29 = vld [vmem:[%s2377_s6 + $0x38] sm:$0xff] }
 0x6a9   : > { %1914 = vmatmul.msk.f32.vlgmr.msra.gmra.mxu3 %vm917_vm3, %v1303_v30  ;;  %v1601_v30 = vld [vmem:[%s2377_s6 + $0x30] sm:$0xff] }
 0x6aa   : > { %1586 = vmatpush.msra.mxu3 %v1566_v24 }
 0x6ac   : > { %1587 = vmatpush.msra.mxu3 %v1565_v25 }
 0x6ae   : > { %1588 = vmatpush.msra.mxu3 %v1564_v26 }
 0x6b0   : > { %1589 = vmatpush.msra.mxu3 %v1563_v27 }
 0x6b1   : > { %1918 = vmatmul.msk.f32.vlgmr.msrb.gmra.mxu3 %vm847_vm2, %v2413_v13 }
 0x72c   : > { %v1324_v34 = vpop.f32.mrf.mxu3 }
 0x72d   : > { %1915 = vmatmul.msk.f32.vlgmr.msrb.gmra.mxu0 %vm917_vm3, %v1324_v34  ;;  %v1599_v34 = vld [vmem:[%s2377_s6 + $0x20] sm:$0xff] }
 0x72e   : > { %1619 = vmatpush.msrb.mxu0 %v1602_v29 }
 0x730   : > { %1620 = vmatpush.msrb.mxu0 %v1601_v30 }
 0x732   : > { %1621 = vmatpush.msrb.mxu0 %v1600_v31 }
 0x734   : > { %v1417_v54 = vpop.f32.mrf.mxu3  ;;  %1622 = vmatpush.msrb.mxu0 %v1599_v34 }
 0x735   : > { %1920 = vmatmul.msk.f32.vlgmr.msra.gmra.mxu0 %vm917_vm3, %v1372_v37  ;;  %v1418_v55 = vadd.f32 %v2020_v53, %v1417_v54 }
 0x736   : > { %1623 = vmatpush.msrb.mxu0 %v1598_v36 }
 0x737   : > { %1490 = vmatpush.msra.mxu1 %v1418_v55  ;;  %v2025_v55 = vld [vmem:[%s2732_s2] ss:$0 sm:$0xff] }
 0x7aa   : > { %v1347_v39 = vpop.f32.mrf.mxu0 }
 0x7ab   : > { %v1350_v40 = vadd.f32 %v1347_v39, %v1181_v38 }
 0x7b2   : > { %v1443_v41 = vpop.f32.mrf.mxu0 }
 0x7b3   : > { %v1446_v42 = vmul.f32 0.35355338, %v1443_v41 }
 0x7b5   : > { %v1447_v43 = vsel %vm2428_vm4, %v1446_v42, -1000000.0 }
 0x7b6   : > { %v1448_v44 = vsel %vm917_vm3, %v1447_v43, -inf }
 0x7b7   : > { %1449 = vmax.xlane.f32.xlu0 %v1448_v44 }
 0x82a   : > { %v1450_v49 = vpop.xlane.xlu0 %1449 }
 0x82b   : > { %v1451_v50 = vsub.f32 %v1447_v43, %v1450_v49  ;;  %v2022_v43 = vld [vmem:[%s2729_s7] ss:$0 sm:$0xff]  ;;  %v1597_v49 = vld [vmem:[%s2377_s6 + $0x10] sm:$0xff] }
 0x82c   : > { %1624 = vmatpush.msrb.mxu0 %v1597_v49 }
 0x82d   : > { %v1452_v28 = vmul.f32 1.442695, %v1451_v50  ;;  %v1596_v50 = vld [vmem:[%s2377_s6 + $0x8] sm:$0xff] }
 0x82e   : > { %1625 = vmatpush.msrb.mxu0 %v1596_v50 }
 0x82f   : > { %2040 = vpow2.f32 %v1452_v28  ;;  %v1595_v28 = vld [vmem:[%s2377_s6] sm:$0xff] }
 0x830   : > { %1626 = vmatpush.msrb.mxu0 %v1595_v28 }
 0x835   : > { %v2041_v51 = vpop.eup %2040 }
 0x836   : > { %v1454_v52 = vsel %vm917_vm3, %v2041_v51, 0.0 }
 0x837   : > { %1455 = vadd.xlane.f32.xlu1 %v1454_v52 }
 0x8aa   : > { %v1456_v57 = vpop.xlane.xlu1 %1455 }
 0x8ab   : > { %2042 = vrcp.f32 %v1456_v57  ;;  %v1468_v61 = vand.u32 2147483648, %v1456_v57  ;;  %v1466_v63 = vand.u32 2147483647, %v1456_v57  ;;  %vm1462_vm4 = vweird.f32 %v1456_v57 }
 0x8ac   : > { %2044 = vrcp.f32 %v2161_v12  ;;  %v2027_v12 = vld [vmem:[%s732_s3] ss:$0 sm:$0xff] }
 0x8ad   : > { %v1469_v1 = vor.u32 1.1754944e-38, %v1468_v61  ;;  %vm1467_vm6 = vcmp.eq.f32.partialorder %v1466_v63, 8.507059e+37 }
 0x8b1   : > { %v2043_v58 = vpop.eup %2042 }
 0x8b2   : > { %v1458_v59 = vmul.f32 %v2043_v58, %v1456_v57  ;;  %vm1463_vm1 = vweird.f32 %v2043_v58  ;;  %v2045_v14 = vpop.eup %2044 }
 0x8b3   : > { %vm1464_vm5 = vmor %vm1462_vm4, %vm1463_vm1  ;;  %v1530_v15 = vmul.f32 32.0, %v2045_v14 }
 0x8b4   : > { %v1459_v60 = vsub.f32 1.0, %v1458_v59 }
 0x8b5   : > { %v1531_v16 = vsub.f32 1.0, %v1530_v15 }
 0x8b6   : > { %v1460_v62 = vmul.f32 %v2043_v58, %v1459_v60 }
 0x8b7   : > { %v1532_v17 = vmul.f32 %v2045_v14, %v1531_v16 }
 0x8b8   : > { %v1461_v0 = vadd.f32 %v2043_v58, %v1460_v62 }
 0x8b9   : > { %v1533_v18 = vadd.f32 %v2045_v14, %v1532_v17 }
 0x8ba   : > { %v1465_v2 = vsel %vm1464_vm5, %v2043_v58, %v1461_v0 }
 0x8bb   : > { %v1470_v3 = vsel %vm1467_vm6, %v1469_v1, %v1465_v2 }
 0x8bc   : > { %v1471_v4 = vmul.f32 %v2041_v51, %v1470_v3  ;;  %v2024_v51 = vld [vmem:[%s2730_s28] ss:$0 sm:$0xff] }
 0x8be   : > { %1921 = vmatmul.msk.f32.vlgmr.msra.gmra.mxu1 %vm917_vm3, %v1471_v4 }
 0x93b   : > { %v1492_v5 = vpop.f32.mrf.mxu1 }
 0x93c   : > { %1922 = vmatmul.msk.f32.vlgmr.msrb.gmra.mxu2 %vm917_vm3, %v1492_v5  ;;  %vm1534_vm3 = vweird.f32 %v2045_v14 }
 0x93d   : > { %v2546_v19 = vsel %vm1534_vm3, %v2045_v14, %v1533_v18 }
 0x9bf   : > { %v1515_v7 = vpop.f32.mrf.mxu2 }
 0x9c0   : > { %v1518_v8 = vadd.f32 %v1515_v7, %v1350_v40 }
 0x9c2   : > { %v1522_v9 = vadd.f32 %v2021_v6, %v1518_v8 }
 0x9c4   : > { %v1523_v10 = vadd.f32 %v1522_v9, %v2413_v13 }
 0x9c6   : > { %v1526_v11 = vsel %vm847_vm2, %v1523_v10, 0.0 }
 0x9c7   : > { %1527 = vadd.xlane.f32.xlu2 %v1526_v11 }
 0xa3a   : > { %v1528_v13 = vpop.xlane.xlu2 %1527 }
 0xa3b   : > { %v1536_v20 = vmul.f32 %v2546_v19, %v1528_v13 }
 0xa3d   : > { %v1537_v21 = vsub.f32 %v1523_v10, %v1536_v20  ;;  %v2026_v10 = vld [vmem:[%s729_s29] ss:$0 sm:$0xff] }
 0xa3f   : > { %v1538_v22 = vmul.f32 %v1537_v21, %v1537_v21 }
 0xa41   : > { %v1539_v23 = vsel %vm847_vm2, %v1538_v22, 0.0 }
 0xa42   : > { %1540 = vadd.xlane.f32.xlu0 %v1539_v23 }
 0xab5   : > { %v1541_v32 = vpop.xlane.xlu0 %1540 }
 0xab6   : > { %v1542_v33 = vmul.f32 %v1541_v32, %v2546_v19 }
 0xab8   : > { %v1543_v35 = vadd.f32 1e-05, %v1542_v33 }
 0xaba   : > { %2046 = vrsqrt.f32 %v1543_v35  ;;  %vm1550_vm8 = vweird.f32 %v1543_v35 }
 0xac0   : > { %v2047_v37 = vpop.eup %2046 }
 0xac1   : > { %v1545_v38 = vmul.f32 %v2047_v37, %v1543_v35  ;;  %vm1551_vm7 = vweird.f32 %v2047_v37 }
 0xac2   : > { %vm1552_vm9 = vmor %vm1550_vm8, %vm1551_vm7 }
 0xac3   : > { %v1546_v39 = vmul.f32 %v2047_v37, %v1545_v38 }
 0xac5   : > { %v1547_v40 = vmul.f32 0.5, %v1546_v39 }
 0xac7   : > { %v1548_v41 = vsub.f32 1.5, %v1547_v40 }
 0xac9   : > { %v1549_v42 = vmul.f32 %v2047_v37, %v1548_v41 }
 0xacb   : > { %v1553_v44 = vsel %vm1552_vm9, %v2047_v37, %v1549_v42 }
 0xacc   : > { %v1554_v45 = vmul.f32 %v1553_v44, %v1537_v21 }
 0xace   : > { %v1558_v47 = vmul.f32 %v2022_v43, %v1554_v45 }
 0xad0   : > { %v1562_v48 = vadd.f32 %v2023_v46, %v1558_v47 }
 0xad2   : > { %1923 = vmatmul.msk.f32.vlgmr.msra.gmra.mxu3 %vm847_vm2, %v1562_v48 }
 0xb55   : > { %v1591_v52 = vpop.f32.mrf.mxu3 }
 0xb56   : > { %v1592_v53 = vadd.f32 %v2024_v51, %v1591_v52 }
 0xb58   : > { %v1594_v54 = vmax.f32 %v1592_v53, 0.0 }
 0xb5a   : > { %1924 = vmatmul.msk.f32.vlgmr.msrb.gmra.mxu0 %vm1607_vm10, %v1594_v54 }
 0xbd7   : > { %v1628_v56 = vpop.f32.mrf.mxu0 }
 0xbd8   : > { %v1629_v57 = vadd.f32 %v2025_v55, %v1628_v56 }
 0xbda   : > { %v1631_v58 = vadd.f32 %v1629_v57, %v1562_v48 }
 0xbdc   : > { %v1634_v59 = vsel %vm847_vm2, %v1631_v58, 0.0 }
 0xbdd   : > { %1635 = vadd.xlane.f32.xlu1 %v1634_v59 }
 0xc50   : > { %v1636_v60 = vpop.xlane.xlu1 %1635 }
 0xc51   : > { %v1637_v61 = vmul.f32 %v1636_v60, %v2546_v19 }
 0xc53   : > { %v1638_v62 = vsub.f32 %v1631_v58, %v1637_v61 }
 0xc55   : > { %v1639_v63 = vmul.f32 %v1638_v62, %v1638_v62 }
 0xc57   : > { %v1640_v0 = vsel %vm847_vm2, %v1639_v63, 0.0 }
 0xc58   : > { %1641 = vadd.xlane.f32.xlu2 %v1640_v0 }
 0xccb   : > { %v1642_v1 = vpop.xlane.xlu2 %1641 }
 0xccc   : > { %v1643_v2 = vmul.f32 %v1642_v1, %v2546_v19 }
 0xcce   : > { %v1644_v3 = vadd.f32 1e-05, %v1643_v2 }
 0xcd0   : > { %2048 = vrsqrt.f32 %v1644_v3  ;;  %vm1651_vm12 = vweird.f32 %v1644_v3 }
 0xcd6   : > { %v2049_v4 = vpop.eup %2048 }
 0xcd7   : > { %v1646_v5 = vmul.f32 %v2049_v4, %v1644_v3  ;;  %vm1652_vm11 = vweird.f32 %v2049_v4 }
 0xcd8   : > { %vm1653_vm13 = vmor %vm1651_vm12, %vm1652_vm11 }
 0xcd9   : > { %v1647_v6 = vmul.f32 %v2049_v4, %v1646_v5 }
 0xcdb   : > { %v1648_v7 = vmul.f32 0.5, %v1647_v6 }
 0xcdd   : > { %v1649_v8 = vsub.f32 1.5, %v1648_v7 }
 0xcdf   : > { %v1650_v9 = vmul.f32 %v2049_v4, %v1649_v8 }
 0xce1   : > { %v1654_v11 = vsel %vm1653_vm13, %v2049_v4, %v1650_v9 }
 0xce2   : > { %v1655_v14 = vmul.f32 %v1654_v11, %v1638_v62 }
 0xce4   : > { %v1659_v15 = vmul.f32 %v2026_v10, %v1655_v14  ;;  %1668 = sbr.rel (%p1925_p1) target bundleno = 3306 (0xcea), region = 92 }
 0xce6   : > { %v1663_v16 = vadd.f32 %v2027_v12, %v1659_v15 }
 0xce8   : > { %1664 = vst.msk [vmem:[#allocation2] sm:$0xff] %vm847_vm2, %v1663_v16 }
 0xce9   : > { %1669 = vst.msk [vmem:[%s683_s12] sm:$0xff] %vm847_vm2, %v1663_v16 }
 0xcea PF: > { %s2735_s29 = sld [smem:[#allocation13_spill]]  ;;  %s1683_s0 = sshll.u32 %s683_s12, 4  ;;  %s1684_s0 = int_to_ptr.vmem [resolvable:$true] %s1683_s0 }
 0xceb   : > { %s2736_s24 = sld [smem:[#allocation10_spill]] }
 0xcec   : > { %s2738_s16 = sld [smem:[#allocation34_spill]] }
 0xcf0   : > { %s1927_s17 = sshll.u32 %s2735_s29, 3 }
 0xcf1   : > { %s2739_s19 = sand.u32 1, %s2736_s24  }
 0xcf2   : > { %s1681_s7 = scalar_lea.hbm %s2738_s16, %s1927_s17  ;;  %s1671_s1 = scalar_lea.sflag [#allocation6], %s2739_s19 }
 0xcf3   : > { %s1685_s18 = sshll.u32 %s1681_s7, 4  ;;  %s2082_s2 = scalar_lea.hbm %s2738_s16, 16  ;;  %s1686_s18 = int_to_ptr.hbm [resolvable:$true] %s1685_s18 }
 0xcf4   : > { %s2076_s28 = sshra.s32 %s1686_s18, 4  ;;  %s2077_s28 = int_to_ptr.hbm [resolvable:$true] %s2076_s28 }
 0xcf5   : > { %s2078_s27 = scalar_lea.hbm %s2077_s28, 8  ;;  %p2083_p6 = scmp.lt.s32.totalorder %s2077_s28, %s2738_s16 }
 0xcf6   : > { %p2079_p2 = scmp.ne.s32.totalorder %s2077_s28, %s2078_s27  ;;  %p2084_p7 = scmp.lt.s32.totalorder %s2082_s2, %s2078_s27 }
 0xcf8   : > { %p2080_p4 = pnand %p2079_p2, %p2304_p3  ;;  %p2085_p8 = por %p2084_p7, %p2083_p6 }
 0xcfa   : > { %p2081_p5 = pneg %p2080_p4 }
 0xcfc   : > { %p2086_p10 = pnand %p2085_p8, %p2081_p5 }
 0xcfe   : > { %2089 = shalt.err (!%p2086_p10)
}
 0xcff   : > { %1935 = dma.vmem_to_hbm [thread:$0]  (%p2304_p3), %s1684_s0, 128, %s1686_s18, %s1671_s1  }
 0xd00 PF: > { %s2740_s12 = sld [smem:[#allocation16_spill]] }
 0xd01   : > { %s2741_s22 = sld [smem:[#allocation9_spill]] }
 0xd06   : > { %p1941_p11 = scmp.ge.s32.totalorder %s2740_s12, 2 }
 0xd07   : > { %s1697_s11 = sand.u32 1, %s2741_s22  }
 0xd08   : > { %p1938_p12 = pnand %p1941_p11, %p2314_p9  ;;  %s1698_s21 = scalar_lea.sflag [#allocation6], %s1697_s11 }
 0xd0a   : > { %p1939_p13 = pneg %p1938_p12 }
 0xd0c   : > { %2125 = dma.done.wait (%p1939_p13), %s1698_s21, 128  }
 0xd0d   : > { %2127 = vsyncadd (%p1939_p13), %s1698_s21, 4294967168  ;;  %s38_s2 = sadd.s32 1, %s2740_s12   ;;  %s2743_s28 = sld [smem:[#allocation10_spill]] }
 0xd0e   : > { %p35_p0 = scmp.ge.s32.totalorder %s38_s2, 6   ;;  %s2744_s29 = sld [smem:[#allocation11_spill]] }
 0xd0f   : > { %s2745_s0 = sld [smem:[#allocation21_spill]] }
 0xd10   : > { %s2746_s30 = sld [smem:[#allocation14_spill]]  ;;  %37 = sbr.rel (!%p35_p0) target bundleno = 30 (0x1e), region = 163 }
 0xd11   : > { %s2747_s18 = sld [smem:[#allocation15_spill]] }
 0xd12   : > { %s2748_s19 = sld [smem:[#allocation17_spill]] }
 0xd13   : > { %s2749_s1 = sld [smem:[#allocation19_spill]] }
 0xd15   :  { %1704 = vsyncpa [#allocation6], 1 }
 0xd16   :  { %1706 = vsyncpa [#allocation6 + $0x1], 1 }

</bundles_post_ra>
